<compile_context>
chip_gen: v7x
topology: tpu7x:2x2x1
jax: 0.10.0
libtpu: 0.0.40
codegen_flags: <defaults>
</compile_context>

<pallas_src>
import functools
import math

import jax
import jax.numpy as jnp
from jax.experimental import pallas as pl
from jax.experimental.pallas import tpu as pltpu


def _lstm_fc_softmax_kernel(num_layers, hidden_size, seq_len, x_ref, *refs):
    """refs = [w_ih_0, w_hh_0, b_0, ..., w_ih_{L-1}, w_hh_{L-1}, b_{L-1},
               fc_w, fc_b, out_ref]"""
    out_ref = refs[-1]
    w_refs = refs[:-1]
    H = hidden_size
    T = seq_len

    x = x_ref[...]                      # [T, Bt, D] float32 (time-major)
    Bt = x.shape[1]

    inp = x                             # current layer input, time-major, f32
    last_h = None
    for l in range(num_layers):
        w_ih = w_refs[3 * l + 0][...]   # [D_l, 4H] bf16
        w_hh = w_refs[3 * l + 1][...]   # [H, 4H]  bf16
        b = w_refs[3 * l + 2][...]      # [1, 4H]  f32  (b_ih + b_hh)

        d_l = inp.shape[-1]
        # One batched MXU matmul for ALL timesteps' input projections of this layer.
        a2d = inp.reshape(T * Bt, d_l).astype(jnp.bfloat16)        # [T*Bt, D_l]
        gx = jnp.dot(a2d, w_ih, preferred_element_type=jnp.float32) + b
        gx = gx.reshape(T, Bt, 4 * H)                              # [T, Bt, 4H] f32

        h = jnp.zeros((Bt, H), jnp.float32)
        c = jnp.zeros((Bt, H), jnp.float32)
        hs = []
        for t in range(T):              # fully unrolled serial recurrence
            gates = gx[t] + jnp.dot(h.astype(jnp.bfloat16), w_hh,
                                    preferred_element_type=jnp.float32)   # [Bt, 4H]
            sig = jax.nn.sigmoid(gates)   # full-width EUP pass
            th = jnp.tanh(gates)          # full-width EUP pass
            i_g = sig[:, 0 * H:1 * H]
            f_g = sig[:, 1 * H:2 * H]
            g_g = th[:, 2 * H:3 * H]
            o_g = sig[:, 3 * H:4 * H]
            c = f_g * c + i_g * g_g
            h = o_g * jnp.tanh(c)
            hs.append(h)
        last_h = h                       # top layer keeps only the final hidden state
        if l + 1 < num_layers:
            inp = jnp.stack(hs, axis=0)  # [T, Bt, H] time-major input for next layer

    fc_w = w_refs[3 * num_layers + 0][...]       # [H, C] bf16
    fc_b = w_refs[3 * num_layers + 1][...]       # [1, C] f32
    logits = jnp.dot(last_h.astype(jnp.bfloat16), fc_w,
                     preferred_element_type=jnp.float32) + fc_b   # [Bt, C]
    # F.softmax on a 2-D tensor defaults to dim=1 (class dim).
    m = jnp.max(logits, axis=-1, keepdims=True)
    e = jnp.exp(logits - m)
    denom = jnp.sum(e, axis=-1, keepdims=True)
    out_ref[...] = e * pl.reciprocal(denom, approx=True)


def rnn_forward(x, params, *, num_layers, hidden_size, num_classes, batch_tile=None):
    B, T, D = x.shape
    if batch_tile is None:
        batch_tile = 8 if (B % 8 == 0) else B
    assert B % batch_tile == 0, "batch_tile must divide batch"
    grid = (B // batch_tile,)

    # Time-major layout (layout plumbing kept outside the kernel; f32 at the boundary
    # so the batch-tiled BlockSpec stays on the f32 (8,128) tiling).
    x_t = jnp.transpose(x, (1, 0, 2)).astype(jnp.float32)          # [T, B, D]

    flat = []
    for l in range(num_layers):
        flat += [params[f"w_ih_{l}"].astype(jnp.bfloat16),
                 params[f"w_hh_{l}"].astype(jnp.bfloat16),
                 params[f"b_{l}"].astype(jnp.float32)]
    flat += [params["fc_w"].astype(jnp.bfloat16),
             params["fc_b"].astype(jnp.float32)]

    kernel = functools.partial(_lstm_fc_softmax_kernel, num_layers, hidden_size, T)

    x_spec = pl.BlockSpec((T, batch_tile, D), lambda b: (0, b, 0))
    w_specs = [pl.BlockSpec(tuple(int(s) for s in w.shape), lambda b: (0, 0))
               for w in flat]                                       # all weights are 2-D
    out_spec = pl.BlockSpec((batch_tile, num_classes), lambda b: (b, 0))

    H, C, L = hidden_size, num_classes, num_layers
    flops = (2 * B * T * D * 4 * H                 # layer-0 input projection
             + 2 * B * T * (L - 1) * H * 4 * H     # deeper-layer input projections
             + 2 * B * T * L * H * 4 * H           # hidden-to-hidden recurrence
             + 2 * B * H * C)                      # final Linear
    transcendentals = B * T * L * (2 * 4 * H + H) + 2 * B * C
    bytes_accessed = (int(x_t.size) * 4
                      + sum(int(w.size) * w.dtype.itemsize for w in flat)
                      + B * C * 4)

    return pl.pallas_call(
        kernel,
        out_shape=jax.ShapeDtypeStruct((B, num_classes), jnp.float32),
        grid=grid,
        in_specs=[x_spec] + w_specs,
        out_specs=out_spec,
        compiler_params=pltpu.CompilerParams(
            dimension_semantics=("parallel",)),      # batch axis -> both TCs on v7x
        cost_estimate=pl.CostEstimate(
            flops=int(flops),
            transcendentals=int(transcendentals),
            bytes_accessed=int(bytes_accessed)),
    )(x_t, *flat)


def init_params(key, input_size, hidden_size, num_layers, num_classes):
    """Deterministic synthetic parameters matching nn.LSTM / nn.Linear shapes."""
    params = {}
    k_lstm = 1.0 / math.sqrt(hidden_size)
    for l in range(num_layers):
        d_in = input_size if l == 0 else hidden_size
        key, k1, k2, k3, k4 = jax.random.split(key, 5)
        params[f"w_ih_{l}"] = jax.random.uniform(
            k1, (d_in, 4 * hidden_size), jnp.float32, -k_lstm, k_lstm)
        params[f"w_hh_{l}"] = jax.random.uniform(
            k2, (hidden_size, 4 * hidden_size), jnp.float32, -k_lstm, k_lstm)
        b_ih = jax.random.uniform(k3, (4 * hidden_size,), jnp.float32, -k_lstm, k_lstm)
        b_hh = jax.random.uniform(k4, (4 * hidden_size,), jnp.float32, -k_lstm, k_lstm)
        params[f"b_{l}"] = (b_ih + b_hh).reshape(1, 4 * hidden_size)
    key, k1, k2 = jax.random.split(key, 3)
    k_fc = 1.0 / math.sqrt(hidden_size)
    params["fc_w"] = jax.random.uniform(
        k1, (hidden_size, num_classes), jnp.float32, -k_fc, k_fc)
    params["fc_b"] = jax.random.uniform(
        k2, (num_classes,), jnp.float32, -k_fc, k_fc).reshape(1, num_classes)
    return params


def _reference_forward(x, params, *, num_layers, hidden_size):
    """Pure-JAX f32 reference (LSTM -> Linear -> softmax), batch_first."""
    B, T, _ = x.shape
    H = hidden_size
    inp = x
    for l in range(num_layers):
        w_ih, w_hh, b = params[f"w_ih_{l}"], params[f"w_hh_{l}"], params[f"b_{l}"]
        h = jnp.zeros((B, H), jnp.float32)
        c = jnp.zeros((B, H), jnp.float32)
        outs = []
        for t in range(T):
            gates = inp[:, t, :] @ w_ih + h @ w_hh + b
            i_g = jax.nn.sigmoid(gates[:, 0 * H:1 * H])
            f_g = jax.nn.sigmoid(gates[:, 1 * H:2 * H])
            g_g = jnp.tanh(gates[:, 2 * H:3 * H])
            o_g = jax.nn.sigmoid(gates[:, 3 * H:4 * H])
            c = f_g * c + i_g * g_g
            h = o_g * jnp.tanh(c)
            outs.append(h)
        inp = jnp.stack(outs, axis=1)
    logits = inp[:, -1, :] @ params["fc_w"] + params["fc_b"]
    return jax.nn.softmax(logits, axis=-1)


if __name__ == "__main__":
    # Small shapes consistent with the module's forward:
    B, T = 8, 8
    input_size, hidden_size, num_layers, num_classes = 16, 32, 2, 8

    key = jax.random.PRNGKey(0)
    key, xk, pk = jax.random.split(key, 3)
    x = jax.random.normal(xk, (B, T, input_size), jnp.float32)
    params = init_params(pk, input_size, hidden_size, num_layers, num_classes)

    out = rnn_forward(
        x, params,
        num_layers=num_layers, hidden_size=hidden_size, num_classes=num_classes)
    out = jax.block_until_ready(out)

    assert out.shape == (B, num_classes)
    # softmax rows must sum to 1 (approx reciprocal -> loose tolerance)
    assert bool(jnp.all(jnp.abs(jnp.sum(out, axis=-1) - 1.0) < 5e-3))

    # Validate against the f32 pure-JAX reference (bf16 weights -> loose tolerance).
    ref = _reference_forward(x, params, num_layers=num_layers, hidden_size=hidden_size)
    max_err = float(jnp.max(jnp.abs(out - ref)))
    assert max_err < 5e-2, f"max abs err vs f32 reference: {max_err}"

    print("KERNEL_OK")
</pallas_src>

<mosaic_0001>
module attributes {stable_mosaic.version = 11 : i64} {
  func.func @_lstm_fc_softmax_kernel(%arg0: i32, %arg1: memref<8x8x16xf32, #tpu.memory_space<vmem>>, %arg2: memref<16x128xbf16, #tpu.memory_space<vmem>>, %arg3: memref<32x128xbf16, #tpu.memory_space<vmem>>, %arg4: memref<1x128xf32, #tpu.memory_space<vmem>>, %arg5: memref<32x128xbf16, #tpu.memory_space<vmem>>, %arg6: memref<32x128xbf16, #tpu.memory_space<vmem>>, %arg7: memref<1x128xf32, #tpu.memory_space<vmem>>, %arg8: memref<32x8xbf16, #tpu.memory_space<vmem>>, %arg9: memref<1x8xf32, #tpu.memory_space<vmem>>, %arg10: memref<8x8xf32, #tpu.memory_space<vmem>>) attributes {dimension_semantics = [#tpu.dimension_semantics<parallel>], iteration_bounds = array<i64: 1>, scalar_prefetch = 0 : i64, scratch_operands = 0 : i64, tpu.core_type = #tpu.core_type<tc>, window_params = [{transform_indices = @transform_0, window_bounds = array<i64: 8, 8, 16>}, {pipeline_mode = #tpu.pipeline_mode<synchronous>, transform_indices = @transform_1, window_bounds = array<i64: 16, 128>}, {pipeline_mode = #tpu.pipeline_mode<synchronous>, transform_indices = @transform_2, window_bounds = array<i64: 32, 128>}, {pipeline_mode = #tpu.pipeline_mode<synchronous>, transform_indices = @transform_3, window_bounds = array<i64: 1, 128>}, {pipeline_mode = #tpu.pipeline_mode<synchronous>, transform_indices = @transform_4, window_bounds = array<i64: 32, 128>}, {pipeline_mode = #tpu.pipeline_mode<synchronous>, transform_indices = @transform_5, window_bounds = array<i64: 32, 128>}, {pipeline_mode = #tpu.pipeline_mode<synchronous>, transform_indices = @transform_6, window_bounds = array<i64: 1, 128>}, {pipeline_mode = #tpu.pipeline_mode<synchronous>, transform_indices = @transform_7, window_bounds = array<i64: 32, 8>}, {pipeline_mode = #tpu.pipeline_mode<synchronous>, transform_indices = @transform_8, window_bounds = array<i64: 1, 8>}, {transform_indices = @transform_9, window_bounds = array<i64: 8, 8>}]} {
    %c0 = arith.constant 0 : index
    %c0_0 = arith.constant 0 : index
    %c0_1 = arith.constant 0 : index
    %0 = vector.load %arg1[%c0, %c0_0, %c0_1] : memref<8x8x16xf32, #tpu.memory_space<vmem>>, vector<8x8x16xf32>
    %c0_2 = arith.constant 0 : index
    %c0_3 = arith.constant 0 : index
    %1 = vector.load %arg2[%c0_2, %c0_3] : memref<16x128xbf16, #tpu.memory_space<vmem>>, vector<16x128xbf16>
    %c0_4 = arith.constant 0 : index
    %c0_5 = arith.constant 0 : index
    %2 = vector.load %arg3[%c0_4, %c0_5] : memref<32x128xbf16, #tpu.memory_space<vmem>>, vector<32x128xbf16>
    %c0_6 = arith.constant 0 : index
    %c0_7 = arith.constant 0 : index
    %3 = vector.load %arg4[%c0_6, %c0_7] : memref<1x128xf32, #tpu.memory_space<vmem>>, vector<1x128xf32>
    %4 = vector.shape_cast %0 : vector<8x8x16xf32> to vector<64x16xf32>
    %5 = arith.truncf %4 : vector<64x16xf32> to vector<64x16xbf16>
    %cst = arith.constant dense<0.000000e+00> : vector<64x128xf32>
    %6 = tpu.matmul %5, %1, %cst {dimension_numbers = #tpu.dot_dimension_numbers<[1], [0], [0], [1], [0, 0, 1, 1], [], []>} : vector<64x16xbf16>, vector<16x128xbf16>, vector<64x128xf32> -> vector<64x128xf32>
    %7 = vector.broadcast %3 : vector<1x128xf32> to vector<64x128xf32>
    %8 = arith.addf %6, %7 : vector<64x128xf32>
    %9 = vector.shape_cast %8 : vector<64x128xf32> to vector<8x8x128xf32>
    %cst_8 = arith.constant 0.000000e+00 : f32
    %10 = vector.broadcast %cst_8 : f32 to vector<8x32xf32>
    %cst_9 = arith.constant 0.000000e+00 : f32
    %11 = vector.broadcast %cst_9 : f32 to vector<8x32xf32>
    %12 = vector.extract_strided_slice %9 {offsets = [0, 0, 0], sizes = [1, 8, 128], strides = [1, 1, 1]} : vector<8x8x128xf32> to vector<1x8x128xf32>
    %13 = vector.shape_cast %12 : vector<1x8x128xf32> to vector<8x128xf32>
    %14 = arith.truncf %10 : vector<8x32xf32> to vector<8x32xbf16>
    %cst_10 = arith.constant dense<0.000000e+00> : vector<8x128xf32>
    %15 = tpu.matmul %14, %2, %cst_10 {dimension_numbers = #tpu.dot_dimension_numbers<[1], [0], [0], [1], [0, 0, 1, 1], [], []>} : vector<8x32xbf16>, vector<32x128xbf16>, vector<8x128xf32> -> vector<8x128xf32>
    %16 = arith.addf %13, %15 : vector<8x128xf32>
    %17 = arith.negf %16 : vector<8x128xf32>
    %18 = math.exp %17 : vector<8x128xf32>
    %cst_11 = arith.constant 1.000000e+00 : f32
    %19 = vector.broadcast %cst_11 : f32 to vector<8x128xf32>
    %20 = arith.addf %19, %18 : vector<8x128xf32>
    %21 = arith.divf %19, %20 : vector<8x128xf32>
    %22 = math.tanh %16 : vector<8x128xf32>
    %23 = vector.extract_strided_slice %21 {offsets = [0, 0], sizes = [8, 32], strides = [1, 1]} : vector<8x128xf32> to vector<8x32xf32>
    %24 = vector.extract_strided_slice %21 {offsets = [0, 32], sizes = [8, 32], strides = [1, 1]} : vector<8x128xf32> to vector<8x32xf32>
    %25 = vector.extract_strided_slice %22 {offsets = [0, 64], sizes = [8, 32], strides = [1, 1]} : vector<8x128xf32> to vector<8x32xf32>
    %26 = vector.extract_strided_slice %21 {offsets = [0, 96], sizes = [8, 32], strides = [1, 1]} : vector<8x128xf32> to vector<8x32xf32>
    %27 = arith.mulf %24, %11 : vector<8x32xf32>
    %28 = arith.mulf %23, %25 : vector<8x32xf32>
    %29 = arith.addf %27, %28 : vector<8x32xf32>
    %30 = math.tanh %29 : vector<8x32xf32>
    %31 = arith.mulf %26, %30 : vector<8x32xf32>
    %32 = vector.extract_strided_slice %9 {offsets = [1, 0, 0], sizes = [1, 8, 128], strides = [1, 1, 1]} : vector<8x8x128xf32> to vector<1x8x128xf32>
    %33 = vector.shape_cast %32 : vector<1x8x128xf32> to vector<8x128xf32>
    %34 = arith.truncf %31 : vector<8x32xf32> to vector<8x32xbf16>
    %cst_12 = arith.constant dense<0.000000e+00> : vector<8x128xf32>
    %35 = tpu.matmul %34, %2, %cst_12 {dimension_numbers = #tpu.dot_dimension_numbers<[1], [0], [0], [1], [0, 0, 1, 1], [], []>} : vector<8x32xbf16>, vector<32x128xbf16>, vector<8x128xf32> -> vector<8x128xf32>
    %36 = arith.addf %33, %35 : vector<8x128xf32>
    %37 = arith.negf %36 : vector<8x128xf32>
    %38 = math.exp %37 : vector<8x128xf32>
    %cst_13 = arith.constant 1.000000e+00 : f32
    %39 = vector.broadcast %cst_13 : f32 to vector<8x128xf32>
    %40 = arith.addf %39, %38 : vector<8x128xf32>
    %41 = arith.divf %39, %40 : vector<8x128xf32>
    %42 = math.tanh %36 : vector<8x128xf32>
    %43 = vector.extract_strided_slice %41 {offsets = [0, 0], sizes = [8, 32], strides = [1, 1]} : vector<8x128xf32> to vector<8x32xf32>
    %44 = vector.extract_strided_slice %41 {offsets = [0, 32], sizes = [8, 32], strides = [1, 1]} : vector<8x128xf32> to vector<8x32xf32>
    %45 = vector.extract_strided_slice %42 {offsets = [0, 64], sizes = [8, 32], strides = [1, 1]} : vector<8x128xf32> to vector<8x32xf32>
    %46 = vector.extract_strided_slice %41 {offsets = [0, 96], sizes = [8, 32], strides = [1, 1]} : vector<8x128xf32> to vector<8x32xf32>
    %47 = arith.mulf %44, %29 : vector<8x32xf32>
    %48 = arith.mulf %43, %45 : vector<8x32xf32>
    %49 = arith.addf %47, %48 : vector<8x32xf32>
    %50 = math.tanh %49 : vector<8x32xf32>
    %51 = arith.mulf %46, %50 : vector<8x32xf32>
    %52 = vector.extract_strided_slice %9 {offsets = [2, 0, 0], sizes = [1, 8, 128], strides = [1, 1, 1]} : vector<8x8x128xf32> to vector<1x8x128xf32>
    %53 = vector.shape_cast %52 : vector<1x8x128xf32> to vector<8x128xf32>
    %54 = arith.truncf %51 : vector<8x32xf32> to vector<8x32xbf16>
    %cst_14 = arith.constant dense<0.000000e+00> : vector<8x128xf32>
    %55 = tpu.matmul %54, %2, %cst_14 {dimension_numbers = #tpu.dot_dimension_numbers<[1], [0], [0], [1], [0, 0, 1, 1], [], []>} : vector<8x32xbf16>, vector<32x128xbf16>, vector<8x128xf32> -> vector<8x128xf32>
    %56 = arith.addf %53, %55 : vector<8x128xf32>
    %57 = arith.negf %56 : vector<8x128xf32>
    %58 = math.exp %57 : vector<8x128xf32>
    %cst_15 = arith.constant 1.000000e+00 : f32
    %59 = vector.broadcast %cst_15 : f32 to vector<8x128xf32>
    %60 = arith.addf %59, %58 : vector<8x128xf32>
    %61 = arith.divf %59, %60 : vector<8x128xf32>
    %62 = math.tanh %56 : vector<8x128xf32>
    %63 = vector.extract_strided_slice %61 {offsets = [0, 0], sizes = [8, 32], strides = [1, 1]} : vector<8x128xf32> to vector<8x32xf32>
    %64 = vector.extract_strided_slice %61 {offsets = [0, 32], sizes = [8, 32], strides = [1, 1]} : vector<8x128xf32> to vector<8x32xf32>
    %65 = vector.extract_strided_slice %62 {offsets = [0, 64], sizes = [8, 32], strides = [1, 1]} : vector<8x128xf32> to vector<8x32xf32>
    %66 = vector.extract_strided_slice %61 {offsets = [0, 96], sizes = [8, 32], strides = [1, 1]} : vector<8x128xf32> to vector<8x32xf32>
    %67 = arith.mulf %64, %49 : vector<8x32xf32>
    %68 = arith.mulf %63, %65 : vector<8x32xf32>
    %69 = arith.addf %67, %68 : vector<8x32xf32>
    %70 = math.tanh %69 : vector<8x32xf32>
    %71 = arith.mulf %66, %70 : vector<8x32xf32>
    %72 = vector.extract_strided_slice %9 {offsets = [3, 0, 0], sizes = [1, 8, 128], strides = [1, 1, 1]} : vector<8x8x128xf32> to vector<1x8x128xf32>
    %73 = vector.shape_cast %72 : vector<1x8x128xf32> to vector<8x128xf32>
    %74 = arith.truncf %71 : vector<8x32xf32> to vector<8x32xbf16>
    %cst_16 = arith.constant dense<0.000000e+00> : vector<8x128xf32>
    %75 = tpu.matmul %74, %2, %cst_16 {dimension_numbers = #tpu.dot_dimension_numbers<[1], [0], [0], [1], [0, 0, 1, 1], [], []>} : vector<8x32xbf16>, vector<32x128xbf16>, vector<8x128xf32> -> vector<8x128xf32>
    %76 = arith.addf %73, %75 : vector<8x128xf32>
    %77 = arith.negf %76 : vector<8x128xf32>
    %78 = math.exp %77 : vector<8x128xf32>
    %cst_17 = arith.constant 1.000000e+00 : f32
    %79 = vector.broadcast %cst_17 : f32 to vector<8x128xf32>
    %80 = arith.addf %79, %78 : vector<8x128xf32>
    %81 = arith.divf %79, %80 : vector<8x128xf32>
    %82 = math.tanh %76 : vector<8x128xf32>
    %83 = vector.extract_strided_slice %81 {offsets = [0, 0], sizes = [8, 32], strides = [1, 1]} : vector<8x128xf32> to vector<8x32xf32>
    %84 = vector.extract_strided_slice %81 {offsets = [0, 32], sizes = [8, 32], strides = [1, 1]} : vector<8x128xf32> to vector<8x32xf32>
    %85 = vector.extract_strided_slice %82 {offsets = [0, 64], sizes = [8, 32], strides = [1, 1]} : vector<8x128xf32> to vector<8x32xf32>
    %86 = vector.extract_strided_slice %81 {offsets = [0, 96], sizes = [8, 32], strides = [1, 1]} : vector<8x128xf32> to vector<8x32xf32>
    %87 = arith.mulf %84, %69 : vector<8x32xf32>
    %88 = arith.mulf %83, %85 : vector<8x32xf32>
    %89 = arith.addf %87, %88 : vector<8x32xf32>
    %90 = math.tanh %89 : vector<8x32xf32>
    %91 = arith.mulf %86, %90 : vector<8x32xf32>
    %92 = vector.extract_strided_slice %9 {offsets = [4, 0, 0], sizes = [1, 8, 128], strides = [1, 1, 1]} : vector<8x8x128xf32> to vector<1x8x128xf32>
    %93 = vector.shape_cast %92 : vector<1x8x128xf32> to vector<8x128xf32>
    %94 = arith.truncf %91 : vector<8x32xf32> to vector<8x32xbf16>
    %cst_18 = arith.constant dense<0.000000e+00> : vector<8x128xf32>
    %95 = tpu.matmul %94, %2, %cst_18 {dimension_numbers = #tpu.dot_dimension_numbers<[1], [0], [0], [1], [0, 0, 1, 1], [], []>} : vector<8x32xbf16>, vector<32x128xbf16>, vector<8x128xf32> -> vector<8x128xf32>
    %96 = arith.addf %93, %95 : vector<8x128xf32>
    %97 = arith.negf %96 : vector<8x128xf32>
    %98 = math.exp %97 : vector<8x128xf32>
    %cst_19 = arith.constant 1.000000e+00 : f32
    %99 = vector.broadcast %cst_19 : f32 to vector<8x128xf32>
    %100 = arith.addf %99, %98 : vector<8x128xf32>
    %101 = arith.divf %99, %100 : vector<8x128xf32>
    %102 = math.tanh %96 : vector<8x128xf32>
    %103 = vector.extract_strided_slice %101 {offsets = [0, 0], sizes = [8, 32], strides = [1, 1]} : vector<8x128xf32> to vector<8x32xf32>
    %104 = vector.extract_strided_slice %101 {offsets = [0, 32], sizes = [8, 32], strides = [1, 1]} : vector<8x128xf32> to vector<8x32xf32>
    %105 = vector.extract_strided_slice %102 {offsets = [0, 64], sizes = [8, 32], strides = [1, 1]} : vector<8x128xf32> to vector<8x32xf32>
    %106 = vector.extract_strided_slice %101 {offsets = [0, 96], sizes = [8, 32], strides = [1, 1]} : vector<8x128xf32> to vector<8x32xf32>
    %107 = arith.mulf %104, %89 : vector<8x32xf32>
    %108 = arith.mulf %103, %105 : vector<8x32xf32>
    %109 = arith.addf %107, %108 : vector<8x32xf32>
    %110 = math.tanh %109 : vector<8x32xf32>
    %111 = arith.mulf %106, %110 : vector<8x32xf32>
    %112 = vector.extract_strided_slice %9 {offsets = [5, 0, 0], sizes = [1, 8, 128], strides = [1, 1, 1]} : vector<8x8x128xf32> to vector<1x8x128xf32>
    %113 = vector.shape_cast %112 : vector<1x8x128xf32> to vector<8x128xf32>
    %114 = arith.truncf %111 : vector<8x32xf32> to vector<8x32xbf16>
    %cst_20 = arith.constant dense<0.000000e+00> : vector<8x128xf32>
    %115 = tpu.matmul %114, %2, %cst_20 {dimension_numbers = #tpu.dot_dimension_numbers<[1], [0], [0], [1], [0, 0, 1, 1], [], []>} : vector<8x32xbf16>, vector<32x128xbf16>, vector<8x128xf32> -> vector<8x128xf32>
    %116 = arith.addf %113, %115 : vector<8x128xf32>
    %117 = arith.negf %116 : vector<8x128xf32>
    %118 = math.exp %117 : vector<8x128xf32>
    %cst_21 = arith.constant 1.000000e+00 : f32
    %119 = vector.broadcast %cst_21 : f32 to vector<8x128xf32>
    %120 = arith.addf %119, %118 : vector<8x128xf32>
    %121 = arith.divf %119, %120 : vector<8x128xf32>
    %122 = math.tanh %116 : vector<8x128xf32>
    %123 = vector.extract_strided_slice %121 {offsets = [0, 0], sizes = [8, 32], strides = [1, 1]} : vector<8x128xf32> to vector<8x32xf32>
    %124 = vector.extract_strided_slice %121 {offsets = [0, 32], sizes = [8, 32], strides = [1, 1]} : vector<8x128xf32> to vector<8x32xf32>
    %125 = vector.extract_strided_slice %122 {offsets = [0, 64], sizes = [8, 32], strides = [1, 1]} : vector<8x128xf32> to vector<8x32xf32>
    %126 = vector.extract_strided_slice %121 {offsets = [0, 96], sizes = [8, 32], strides = [1, 1]} : vector<8x128xf32> to vector<8x32xf32>
    %127 = arith.mulf %124, %109 : vector<8x32xf32>
    %128 = arith.mulf %123, %125 : vector<8x32xf32>
    %129 = arith.addf %127, %128 : vector<8x32xf32>
    %130 = math.tanh %129 : vector<8x32xf32>
    %131 = arith.mulf %126, %130 : vector<8x32xf32>
    %132 = vector.extract_strided_slice %9 {offsets = [6, 0, 0], sizes = [1, 8, 128], strides = [1, 1, 1]} : vector<8x8x128xf32> to vector<1x8x128xf32>
    %133 = vector.shape_cast %132 : vector<1x8x128xf32> to vector<8x128xf32>
    %134 = arith.truncf %131 : vector<8x32xf32> to vector<8x32xbf16>
    %cst_22 = arith.constant dense<0.000000e+00> : vector<8x128xf32>
    %135 = tpu.matmul %134, %2, %cst_22 {dimension_numbers = #tpu.dot_dimension_numbers<[1], [0], [0], [1], [0, 0, 1, 1], [], []>} : vector<8x32xbf16>, vector<32x128xbf16>, vector<8x128xf32> -> vector<8x128xf32>
    %136 = arith.addf %133, %135 : vector<8x128xf32>
    %137 = arith.negf %136 : vector<8x128xf32>
    %138 = math.exp %137 : vector<8x128xf32>
    %cst_23 = arith.constant 1.000000e+00 : f32
    %139 = vector.broadcast %cst_23 : f32 to vector<8x128xf32>
    %140 = arith.addf %139, %138 : vector<8x128xf32>
    %141 = arith.divf %139, %140 : vector<8x128xf32>
    %142 = math.tanh %136 : vector<8x128xf32>
    %143 = vector.extract_strided_slice %141 {offsets = [0, 0], sizes = [8, 32], strides = [1, 1]} : vector<8x128xf32> to vector<8x32xf32>
    %144 = vector.extract_strided_slice %141 {offsets = [0, 32], sizes = [8, 32], strides = [1, 1]} : vector<8x128xf32> to vector<8x32xf32>
    %145 = vector.extract_strided_slice %142 {offsets = [0, 64], sizes = [8, 32], strides = [1, 1]} : vector<8x128xf32> to vector<8x32xf32>
    %146 = vector.extract_strided_slice %141 {offsets = [0, 96], sizes = [8, 32], strides = [1, 1]} : vector<8x128xf32> to vector<8x32xf32>
    %147 = arith.mulf %144, %129 : vector<8x32xf32>
    %148 = arith.mulf %143, %145 : vector<8x32xf32>
    %149 = arith.addf %147, %148 : vector<8x32xf32>
    %150 = math.tanh %149 : vector<8x32xf32>
    %151 = arith.mulf %146, %150 : vector<8x32xf32>
    %152 = vector.extract_strided_slice %9 {offsets = [7, 0, 0], sizes = [1, 8, 128], strides = [1, 1, 1]} : vector<8x8x128xf32> to vector<1x8x128xf32>
    %153 = vector.shape_cast %152 : vector<1x8x128xf32> to vector<8x128xf32>
    %154 = arith.truncf %151 : vector<8x32xf32> to vector<8x32xbf16>
    %cst_24 = arith.constant dense<0.000000e+00> : vector<8x128xf32>
    %155 = tpu.matmul %154, %2, %cst_24 {dimension_numbers = #tpu.dot_dimension_numbers<[1], [0], [0], [1], [0, 0, 1, 1], [], []>} : vector<8x32xbf16>, vector<32x128xbf16>, vector<8x128xf32> -> vector<8x128xf32>
    %156 = arith.addf %153, %155 : vector<8x128xf32>
    %157 = arith.negf %156 : vector<8x128xf32>
    %158 = math.exp %157 : vector<8x128xf32>
    %cst_25 = arith.constant 1.000000e+00 : f32
    %159 = vector.broadcast %cst_25 : f32 to vector<8x128xf32>
    %160 = arith.addf %159, %158 : vector<8x128xf32>
    %161 = arith.divf %159, %160 : vector<8x128xf32>
    %162 = math.tanh %156 : vector<8x128xf32>
    %163 = vector.extract_strided_slice %161 {offsets = [0, 0], sizes = [8, 32], strides = [1, 1]} : vector<8x128xf32> to vector<8x32xf32>
    %164 = vector.extract_strided_slice %161 {offsets = [0, 32], sizes = [8, 32], strides = [1, 1]} : vector<8x128xf32> to vector<8x32xf32>
    %165 = vector.extract_strided_slice %162 {offsets = [0, 64], sizes = [8, 32], strides = [1, 1]} : vector<8x128xf32> to vector<8x32xf32>
    %166 = vector.extract_strided_slice %161 {offsets = [0, 96], sizes = [8, 32], strides = [1, 1]} : vector<8x128xf32> to vector<8x32xf32>
    %167 = arith.mulf %164, %149 : vector<8x32xf32>
    %168 = arith.mulf %163, %165 : vector<8x32xf32>
    %169 = arith.addf %167, %168 : vector<8x32xf32>
    %170 = math.tanh %169 : vector<8x32xf32>
    %171 = arith.mulf %166, %170 : vector<8x32xf32>
    %172 = vector.shape_cast %31 : vector<8x32xf32> to vector<1x8x32xf32>
    %173 = vector.shape_cast %51 : vector<8x32xf32> to vector<1x8x32xf32>
    %174 = vector.shape_cast %71 : vector<8x32xf32> to vector<1x8x32xf32>
    %175 = vector.shape_cast %91 : vector<8x32xf32> to vector<1x8x32xf32>
    %176 = vector.shape_cast %111 : vector<8x32xf32> to vector<1x8x32xf32>
    %177 = vector.shape_cast %131 : vector<8x32xf32> to vector<1x8x32xf32>
    %178 = vector.shape_cast %151 : vector<8x32xf32> to vector<1x8x32xf32>
    %179 = vector.shape_cast %171 : vector<8x32xf32> to vector<1x8x32xf32>
    %180 = tpu.concatenate %172, %173, %174, %175, %176, %177, %178, %179 in 0 : vector<1x8x32xf32>, vector<1x8x32xf32>, vector<1x8x32xf32>, vector<1x8x32xf32>, vector<1x8x32xf32>, vector<1x8x32xf32>, vector<1x8x32xf32>, vector<1x8x32xf32> -> vector<8x8x32xf32>
    %c0_26 = arith.constant 0 : index
    %c0_27 = arith.constant 0 : index
    %181 = vector.load %arg5[%c0_26, %c0_27] : memref<32x128xbf16, #tpu.memory_space<vmem>>, vector<32x128xbf16>
    %c0_28 = arith.constant 0 : index
    %c0_29 = arith.constant 0 : index
    %182 = vector.load %arg6[%c0_28, %c0_29] : memref<32x128xbf16, #tpu.memory_space<vmem>>, vector<32x128xbf16>
    %c0_30 = arith.constant 0 : index
    %c0_31 = arith.constant 0 : index
    %183 = vector.load %arg7[%c0_30, %c0_31] : memref<1x128xf32, #tpu.memory_space<vmem>>, vector<1x128xf32>
    %184 = vector.shape_cast %180 : vector<8x8x32xf32> to vector<64x32xf32>
    %185 = arith.truncf %184 : vector<64x32xf32> to vector<64x32xbf16>
    %cst_32 = arith.constant dense<0.000000e+00> : vector<64x128xf32>
    %186 = tpu.matmul %185, %181, %cst_32 {dimension_numbers = #tpu.dot_dimension_numbers<[1], [0], [0], [1], [0, 0, 1, 1], [], []>} : vector<64x32xbf16>, vector<32x128xbf16>, vector<64x128xf32> -> vector<64x128xf32>
    %187 = vector.broadcast %183 : vector<1x128xf32> to vector<64x128xf32>
    %188 = arith.addf %186, %187 : vector<64x128xf32>
    %189 = vector.shape_cast %188 : vector<64x128xf32> to vector<8x8x128xf32>
    %cst_33 = arith.constant 0.000000e+00 : f32
    %190 = vector.broadcast %cst_33 : f32 to vector<8x32xf32>
    %cst_34 = arith.constant 0.000000e+00 : f32
    %191 = vector.broadcast %cst_34 : f32 to vector<8x32xf32>
    %192 = vector.extract_strided_slice %189 {offsets = [0, 0, 0], sizes = [1, 8, 128], strides = [1, 1, 1]} : vector<8x8x128xf32> to vector<1x8x128xf32>
    %193 = vector.shape_cast %192 : vector<1x8x128xf32> to vector<8x128xf32>
    %194 = arith.truncf %190 : vector<8x32xf32> to vector<8x32xbf16>
    %cst_35 = arith.constant dense<0.000000e+00> : vector<8x128xf32>
    %195 = tpu.matmul %194, %182, %cst_35 {dimension_numbers = #tpu.dot_dimension_numbers<[1], [0], [0], [1], [0, 0, 1, 1], [], []>} : vector<8x32xbf16>, vector<32x128xbf16>, vector<8x128xf32> -> vector<8x128xf32>
    %196 = arith.addf %193, %195 : vector<8x128xf32>
    %197 = arith.negf %196 : vector<8x128xf32>
    %198 = math.exp %197 : vector<8x128xf32>
    %cst_36 = arith.constant 1.000000e+00 : f32
    %199 = vector.broadcast %cst_36 : f32 to vector<8x128xf32>
    %200 = arith.addf %199, %198 : vector<8x128xf32>
    %201 = arith.divf %199, %200 : vector<8x128xf32>
    %202 = math.tanh %196 : vector<8x128xf32>
    %203 = vector.extract_strided_slice %201 {offsets = [0, 0], sizes = [8, 32], strides = [1, 1]} : vector<8x128xf32> to vector<8x32xf32>
    %204 = vector.extract_strided_slice %201 {offsets = [0, 32], sizes = [8, 32], strides = [1, 1]} : vector<8x128xf32> to vector<8x32xf32>
    %205 = vector.extract_strided_slice %202 {offsets = [0, 64], sizes = [8, 32], strides = [1, 1]} : vector<8x128xf32> to vector<8x32xf32>
    %206 = vector.extract_strided_slice %201 {offsets = [0, 96], sizes = [8, 32], strides = [1, 1]} : vector<8x128xf32> to vector<8x32xf32>
    %207 = arith.mulf %204, %191 : vector<8x32xf32>
    %208 = arith.mulf %203, %205 : vector<8x32xf32>
    %209 = arith.addf %207, %208 : vector<8x32xf32>
    %210 = math.tanh %209 : vector<8x32xf32>
    %211 = arith.mulf %206, %210 : vector<8x32xf32>
    %212 = vector.extract_strided_slice %189 {offsets = [1, 0, 0], sizes = [1, 8, 128], strides = [1, 1, 1]} : vector<8x8x128xf32> to vector<1x8x128xf32>
    %213 = vector.shape_cast %212 : vector<1x8x128xf32> to vector<8x128xf32>
    %214 = arith.truncf %211 : vector<8x32xf32> to vector<8x32xbf16>
    %cst_37 = arith.constant dense<0.000000e+00> : vector<8x128xf32>
    %215 = tpu.matmul %214, %182, %cst_37 {dimension_numbers = #tpu.dot_dimension_numbers<[1], [0], [0], [1], [0, 0, 1, 1], [], []>} : vector<8x32xbf16>, vector<32x128xbf16>, vector<8x128xf32> -> vector<8x128xf32>
    %216 = arith.addf %213, %215 : vector<8x128xf32>
    %217 = arith.negf %216 : vector<8x128xf32>
    %218 = math.exp %217 : vector<8x128xf32>
    %cst_38 = arith.constant 1.000000e+00 : f32
    %219 = vector.broadcast %cst_38 : f32 to vector<8x128xf32>
    %220 = arith.addf %219, %218 : vector<8x128xf32>
    %221 = arith.divf %219, %220 : vector<8x128xf32>
    %222 = math.tanh %216 : vector<8x128xf32>
    %223 = vector.extract_strided_slice %221 {offsets = [0, 0], sizes = [8, 32], strides = [1, 1]} : vector<8x128xf32> to vector<8x32xf32>
    %224 = vector.extract_strided_slice %221 {offsets = [0, 32], sizes = [8, 32], strides = [1, 1]} : vector<8x128xf32> to vector<8x32xf32>
    %225 = vector.extract_strided_slice %222 {offsets = [0, 64], sizes = [8, 32], strides = [1, 1]} : vector<8x128xf32> to vector<8x32xf32>
    %226 = vector.extract_strided_slice %221 {offsets = [0, 96], sizes = [8, 32], strides = [1, 1]} : vector<8x128xf32> to vector<8x32xf32>
    %227 = arith.mulf %224, %209 : vector<8x32xf32>
    %228 = arith.mulf %223, %225 : vector<8x32xf32>
    %229 = arith.addf %227, %228 : vector<8x32xf32>
    %230 = math.tanh %229 : vector<8x32xf32>
    %231 = arith.mulf %226, %230 : vector<8x32xf32>
    %232 = vector.extract_strided_slice %189 {offsets = [2, 0, 0], sizes = [1, 8, 128], strides = [1, 1, 1]} : vector<8x8x128xf32> to vector<1x8x128xf32>
    %233 = vector.shape_cast %232 : vector<1x8x128xf32> to vector<8x128xf32>
    %234 = arith.truncf %231 : vector<8x32xf32> to vector<8x32xbf16>
    %cst_39 = arith.constant dense<0.000000e+00> : vector<8x128xf32>
    %235 = tpu.matmul %234, %182, %cst_39 {dimension_numbers = #tpu.dot_dimension_numbers<[1], [0], [0], [1], [0, 0, 1, 1], [], []>} : vector<8x32xbf16>, vector<32x128xbf16>, vector<8x128xf32> -> vector<8x128xf32>
    %236 = arith.addf %233, %235 : vector<8x128xf32>
    %237 = arith.negf %236 : vector<8x128xf32>
    %238 = math.exp %237 : vector<8x128xf32>
    %cst_40 = arith.constant 1.000000e+00 : f32
    %239 = vector.broadcast %cst_40 : f32 to vector<8x128xf32>
    %240 = arith.addf %239, %238 : vector<8x128xf32>
    %241 = arith.divf %239, %240 : vector<8x128xf32>
    %242 = math.tanh %236 : vector<8x128xf32>
    %243 = vector.extract_strided_slice %241 {offsets = [0, 0], sizes = [8, 32], strides = [1, 1]} : vector<8x128xf32> to vector<8x32xf32>
    %244 = vector.extract_strided_slice %241 {offsets = [0, 32], sizes = [8, 32], strides = [1, 1]} : vector<8x128xf32> to vector<8x32xf32>
    %245 = vector.extract_strided_slice %242 {offsets = [0, 64], sizes = [8, 32], strides = [1, 1]} : vector<8x128xf32> to vector<8x32xf32>
    %246 = vector.extract_strided_slice %241 {offsets = [0, 96], sizes = [8, 32], strides = [1, 1]} : vector<8x128xf32> to vector<8x32xf32>
    %247 = arith.mulf %244, %229 : vector<8x32xf32>
    %248 = arith.mulf %243, %245 : vector<8x32xf32>
    %249 = arith.addf %247, %248 : vector<8x32xf32>
    %250 = math.tanh %249 : vector<8x32xf32>
    %251 = arith.mulf %246, %250 : vector<8x32xf32>
    %252 = vector.extract_strided_slice %189 {offsets = [3, 0, 0], sizes = [1, 8, 128], strides = [1, 1, 1]} : vector<8x8x128xf32> to vector<1x8x128xf32>
    %253 = vector.shape_cast %252 : vector<1x8x128xf32> to vector<8x128xf32>
    %254 = arith.truncf %251 : vector<8x32xf32> to vector<8x32xbf16>
    %cst_41 = arith.constant dense<0.000000e+00> : vector<8x128xf32>
    %255 = tpu.matmul %254, %182, %cst_41 {dimension_numbers = #tpu.dot_dimension_numbers<[1], [0], [0], [1], [0, 0, 1, 1], [], []>} : vector<8x32xbf16>, vector<32x128xbf16>, vector<8x128xf32> -> vector<8x128xf32>
    %256 = arith.addf %253, %255 : vector<8x128xf32>
    %257 = arith.negf %256 : vector<8x128xf32>
    %258 = math.exp %257 : vector<8x128xf32>
    %cst_42 = arith.constant 1.000000e+00 : f32
    %259 = vector.broadcast %cst_42 : f32 to vector<8x128xf32>
    %260 = arith.addf %259, %258 : vector<8x128xf32>
    %261 = arith.divf %259, %260 : vector<8x128xf32>
    %262 = math.tanh %256 : vector<8x128xf32>
    %263 = vector.extract_strided_slice %261 {offsets = [0, 0], sizes = [8, 32], strides = [1, 1]} : vector<8x128xf32> to vector<8x32xf32>
    %264 = vector.extract_strided_slice %261 {offsets = [0, 32], sizes = [8, 32], strides = [1, 1]} : vector<8x128xf32> to vector<8x32xf32>
    %265 = vector.extract_strided_slice %262 {offsets = [0, 64], sizes = [8, 32], strides = [1, 1]} : vector<8x128xf32> to vector<8x32xf32>
    %266 = vector.extract_strided_slice %261 {offsets = [0, 96], sizes = [8, 32], strides = [1, 1]} : vector<8x128xf32> to vector<8x32xf32>
    %267 = arith.mulf %264, %249 : vector<8x32xf32>
    %268 = arith.mulf %263, %265 : vector<8x32xf32>
    %269 = arith.addf %267, %268 : vector<8x32xf32>
    %270 = math.tanh %269 : vector<8x32xf32>
    %271 = arith.mulf %266, %270 : vector<8x32xf32>
    %272 = vector.extract_strided_slice %189 {offsets = [4, 0, 0], sizes = [1, 8, 128], strides = [1, 1, 1]} : vector<8x8x128xf32> to vector<1x8x128xf32>
    %273 = vector.shape_cast %272 : vector<1x8x128xf32> to vector<8x128xf32>
    %274 = arith.truncf %271 : vector<8x32xf32> to vector<8x32xbf16>
    %cst_43 = arith.constant dense<0.000000e+00> : vector<8x128xf32>
    %275 = tpu.matmul %274, %182, %cst_43 {dimension_numbers = #tpu.dot_dimension_numbers<[1], [0], [0], [1], [0, 0, 1, 1], [], []>} : vector<8x32xbf16>, vector<32x128xbf16>, vector<8x128xf32> -> vector<8x128xf32>
    %276 = arith.addf %273, %275 : vector<8x128xf32>
    %277 = arith.negf %276 : vector<8x128xf32>
    %278 = math.exp %277 : vector<8x128xf32>
    %cst_44 = arith.constant 1.000000e+00 : f32
    %279 = vector.broadcast %cst_44 : f32 to vector<8x128xf32>
    %280 = arith.addf %279, %278 : vector<8x128xf32>
    %281 = arith.divf %279, %280 : vector<8x128xf32>
    %282 = math.tanh %276 : vector<8x128xf32>
    %283 = vector.extract_strided_slice %281 {offsets = [0, 0], sizes = [8, 32], strides = [1, 1]} : vector<8x128xf32> to vector<8x32xf32>
    %284 = vector.extract_strided_slice %281 {offsets = [0, 32], sizes = [8, 32], strides = [1, 1]} : vector<8x128xf32> to vector<8x32xf32>
    %285 = vector.extract_strided_slice %282 {offsets = [0, 64], sizes = [8, 32], strides = [1, 1]} : vector<8x128xf32> to vector<8x32xf32>
    %286 = vector.extract_strided_slice %281 {offsets = [0, 96], sizes = [8, 32], strides = [1, 1]} : vector<8x128xf32> to vector<8x32xf32>
    %287 = arith.mulf %284, %269 : vector<8x32xf32>
    %288 = arith.mulf %283, %285 : vector<8x32xf32>
    %289 = arith.addf %287, %288 : vector<8x32xf32>
    %290 = math.tanh %289 : vector<8x32xf32>
    %291 = arith.mulf %286, %290 : vector<8x32xf32>
    %292 = vector.extract_strided_slice %189 {offsets = [5, 0, 0], sizes = [1, 8, 128], strides = [1, 1, 1]} : vector<8x8x128xf32> to vector<1x8x128xf32>
    %293 = vector.shape_cast %292 : vector<1x8x128xf32> to vector<8x128xf32>
    %294 = arith.truncf %291 : vector<8x32xf32> to vector<8x32xbf16>
    %cst_45 = arith.constant dense<0.000000e+00> : vector<8x128xf32>
    %295 = tpu.matmul %294, %182, %cst_45 {dimension_numbers = #tpu.dot_dimension_numbers<[1], [0], [0], [1], [0, 0, 1, 1], [], []>} : vector<8x32xbf16>, vector<32x128xbf16>, vector<8x128xf32> -> vector<8x128xf32>
    %296 = arith.addf %293, %295 : vector<8x128xf32>
    %297 = arith.negf %296 : vector<8x128xf32>
    %298 = math.exp %297 : vector<8x128xf32>
    %cst_46 = arith.constant 1.000000e+00 : f32
    %299 = vector.broadcast %cst_46 : f32 to vector<8x128xf32>
    %300 = arith.addf %299, %298 : vector<8x128xf32>
    %301 = arith.divf %299, %300 : vector<8x128xf32>
    %302 = math.tanh %296 : vector<8x128xf32>
    %303 = vector.extract_strided_slice %301 {offsets = [0, 0], sizes = [8, 32], strides = [1, 1]} : vector<8x128xf32> to vector<8x32xf32>
    %304 = vector.extract_strided_slice %301 {offsets = [0, 32], sizes = [8, 32], strides = [1, 1]} : vector<8x128xf32> to vector<8x32xf32>
    %305 = vector.extract_strided_slice %302 {offsets = [0, 64], sizes = [8, 32], strides = [1, 1]} : vector<8x128xf32> to vector<8x32xf32>
    %306 = vector.extract_strided_slice %301 {offsets = [0, 96], sizes = [8, 32], strides = [1, 1]} : vector<8x128xf32> to vector<8x32xf32>
    %307 = arith.mulf %304, %289 : vector<8x32xf32>
    %308 = arith.mulf %303, %305 : vector<8x32xf32>
    %309 = arith.addf %307, %308 : vector<8x32xf32>
    %310 = math.tanh %309 : vector<8x32xf32>
    %311 = arith.mulf %306, %310 : vector<8x32xf32>
    %312 = vector.extract_strided_slice %189 {offsets = [6, 0, 0], sizes = [1, 8, 128], strides = [1, 1, 1]} : vector<8x8x128xf32> to vector<1x8x128xf32>
    %313 = vector.shape_cast %312 : vector<1x8x128xf32> to vector<8x128xf32>
    %314 = arith.truncf %311 : vector<8x32xf32> to vector<8x32xbf16>
    %cst_47 = arith.constant dense<0.000000e+00> : vector<8x128xf32>
    %315 = tpu.matmul %314, %182, %cst_47 {dimension_numbers = #tpu.dot_dimension_numbers<[1], [0], [0], [1], [0, 0, 1, 1], [], []>} : vector<8x32xbf16>, vector<32x128xbf16>, vector<8x128xf32> -> vector<8x128xf32>
    %316 = arith.addf %313, %315 : vector<8x128xf32>
    %317 = arith.negf %316 : vector<8x128xf32>
    %318 = math.exp %317 : vector<8x128xf32>
    %cst_48 = arith.constant 1.000000e+00 : f32
    %319 = vector.broadcast %cst_48 : f32 to vector<8x128xf32>
    %320 = arith.addf %319, %318 : vector<8x128xf32>
    %321 = arith.divf %319, %320 : vector<8x128xf32>
    %322 = math.tanh %316 : vector<8x128xf32>
    %323 = vector.extract_strided_slice %321 {offsets = [0, 0], sizes = [8, 32], strides = [1, 1]} : vector<8x128xf32> to vector<8x32xf32>
    %324 = vector.extract_strided_slice %321 {offsets = [0, 32], sizes = [8, 32], strides = [1, 1]} : vector<8x128xf32> to vector<8x32xf32>
    %325 = vector.extract_strided_slice %322 {offsets = [0, 64], sizes = [8, 32], strides = [1, 1]} : vector<8x128xf32> to vector<8x32xf32>
    %326 = vector.extract_strided_slice %321 {offsets = [0, 96], sizes = [8, 32], strides = [1, 1]} : vector<8x128xf32> to vector<8x32xf32>
    %327 = arith.mulf %324, %309 : vector<8x32xf32>
    %328 = arith.mulf %323, %325 : vector<8x32xf32>
    %329 = arith.addf %327, %328 : vector<8x32xf32>
    %330 = math.tanh %329 : vector<8x32xf32>
    %331 = arith.mulf %326, %330 : vector<8x32xf32>
    %332 = vector.extract_strided_slice %189 {offsets = [7, 0, 0], sizes = [1, 8, 128], strides = [1, 1, 1]} : vector<8x8x128xf32> to vector<1x8x128xf32>
    %333 = vector.shape_cast %332 : vector<1x8x128xf32> to vector<8x128xf32>
    %334 = arith.truncf %331 : vector<8x32xf32> to vector<8x32xbf16>
    %cst_49 = arith.constant dense<0.000000e+00> : vector<8x128xf32>
    %335 = tpu.matmul %334, %182, %cst_49 {dimension_numbers = #tpu.dot_dimension_numbers<[1], [0], [0], [1], [0, 0, 1, 1], [], []>} : vector<8x32xbf16>, vector<32x128xbf16>, vector<8x128xf32> -> vector<8x128xf32>
    %336 = arith.addf %333, %335 : vector<8x128xf32>
    %337 = arith.negf %336 : vector<8x128xf32>
    %338 = math.exp %337 : vector<8x128xf32>
    %cst_50 = arith.constant 1.000000e+00 : f32
    %339 = vector.broadcast %cst_50 : f32 to vector<8x128xf32>
    %340 = arith.addf %339, %338 : vector<8x128xf32>
    %341 = arith.divf %339, %340 : vector<8x128xf32>
    %342 = math.tanh %336 : vector<8x128xf32>
    %343 = vector.extract_strided_slice %341 {offsets = [0, 0], sizes = [8, 32], strides = [1, 1]} : vector<8x128xf32> to vector<8x32xf32>
    %344 = vector.extract_strided_slice %341 {offsets = [0, 32], sizes = [8, 32], strides = [1, 1]} : vector<8x128xf32> to vector<8x32xf32>
    %345 = vector.extract_strided_slice %342 {offsets = [0, 64], sizes = [8, 32], strides = [1, 1]} : vector<8x128xf32> to vector<8x32xf32>
    %346 = vector.extract_strided_slice %341 {offsets = [0, 96], sizes = [8, 32], strides = [1, 1]} : vector<8x128xf32> to vector<8x32xf32>
    %347 = arith.mulf %344, %329 : vector<8x32xf32>
    %348 = arith.mulf %343, %345 : vector<8x32xf32>
    %349 = arith.addf %347, %348 : vector<8x32xf32>
    %350 = math.tanh %349 : vector<8x32xf32>
    %351 = arith.mulf %346, %350 : vector<8x32xf32>
    %c0_51 = arith.constant 0 : index
    %c0_52 = arith.constant 0 : index
    %352 = vector.load %arg8[%c0_51, %c0_52] : memref<32x8xbf16, #tpu.memory_space<vmem>>, vector<32x8xbf16>
    %c0_53 = arith.constant 0 : index
    %c0_54 = arith.constant 0 : index
    %353 = vector.load %arg9[%c0_53, %c0_54] : memref<1x8xf32, #tpu.memory_space<vmem>>, vector<1x8xf32>
    %354 = arith.truncf %351 : vector<8x32xf32> to vector<8x32xbf16>
    %cst_55 = arith.constant dense<0.000000e+00> : vector<8x8xf32>
    %355 = tpu.matmul %354, %352, %cst_55 {dimension_numbers = #tpu.dot_dimension_numbers<[1], [0], [0], [1], [0, 0, 1, 1], [], []>} : vector<8x32xbf16>, vector<32x8xbf16>, vector<8x8xf32> -> vector<8x8xf32>
    %356 = vector.broadcast %353 : vector<1x8xf32> to vector<8x8xf32>
    %357 = arith.addf %355, %356 : vector<8x8xf32>
    %cst_56 = arith.constant dense<0xFF800000> : vector<8xf32>
    %358 = vector.multi_reduction <maximumf>, %357, %cst_56 [1] : vector<8x8xf32> to vector<8xf32>
    %359 = vector.shape_cast %358 : vector<8xf32> to vector<8x1xf32>
    %360 = vector.broadcast %359 : vector<8x1xf32> to vector<8x8xf32>
    %361 = arith.subf %357, %360 : vector<8x8xf32>
    %362 = math.exp %361 : vector<8x8xf32>
    %cst_57 = arith.constant dense<0.000000e+00> : vector<8xf32>
    %363 = vector.multi_reduction <add>, %362, %cst_57 [1] : vector<8x8xf32> to vector<8xf32>
    %364 = vector.shape_cast %363 : vector<8xf32> to vector<8x1xf32>
    %365 = tpu.reciprocal %364 {approx = true} : vector<8x1xf32> -> vector<8x1xf32>
    %366 = vector.broadcast %365 : vector<8x1xf32> to vector<8x8xf32>
    %367 = arith.mulf %362, %366 : vector<8x8xf32>
    %c0_58 = arith.constant 0 : index
    %c0_59 = arith.constant 0 : index
    %368 = vector.load %arg10[%c0_58, %c0_59] : memref<8x8xf32, #tpu.memory_space<vmem>>, vector<8x8xf32>
    tpu.vector_store %arg10[%c0_58, %c0_59], %367 {strides = array<i32>} : memref<8x8xf32, #tpu.memory_space<vmem>>, vector<8x8xf32>,
    return
  }
  func.func @transform_0(%arg0: i32) -> (i32, i32, i32) {
    %c0_i32 = arith.constant 0 : i32
    %c0_i32_0 = arith.constant 0 : i32
    %c0_i32_1 = arith.constant 0 : i32
    return %c0_i32, %arg0, %c0_i32_0 : i32, i32, i32
  }
  func.func @transform_1(%arg0: i32) -> (i32, i32) {
    %c0_i32 = arith.constant 0 : i32
    %c0_i32_0 = arith.constant 0 : i32
    %c0_i32_1 = arith.constant 0 : i32
    return %c0_i32, %c0_i32_0 : i32, i32
  }
  func.func @transform_2(%arg0: i32) -> (i32, i32) {
    %c0_i32 = arith.constant 0 : i32
    %c0_i32_0 = arith.constant 0 : i32
    %c0_i32_1 = arith.constant 0 : i32
    return %c0_i32, %c0_i32_0 : i32, i32
  }
  func.func @transform_3(%arg0: i32) -> (i32, i32) {
    %c0_i32 = arith.constant 0 : i32
    %c0_i32_0 = arith.constant 0 : i32
    %c0_i32_1 = arith.constant 0 : i32
    return %c0_i32, %c0_i32_0 : i32, i32
  }
  func.func @transform_4(%arg0: i32) -> (i32, i32) {
    %c0_i32 = arith.constant 0 : i32
    %c0_i32_0 = arith.constant 0 : i32
    %c0_i32_1 = arith.constant 0 : i32
    return %c0_i32, %c0_i32_0 : i32, i32
  }
  func.func @transform_5(%arg0: i32) -> (i32, i32) {
    %c0_i32 = arith.constant 0 : i32
    %c0_i32_0 = arith.constant 0 : i32
    %c0_i32_1 = arith.constant 0 : i32
    return %c0_i32, %c0_i32_0 : i32, i32
  }
  func.func @transform_6(%arg0: i32) -> (i32, i32) {
    %c0_i32 = arith.constant 0 : i32
    %c0_i32_0 = arith.constant 0 : i32
    %c0_i32_1 = arith.constant 0 : i32
    return %c0_i32, %c0_i32_0 : i32, i32
  }
  func.func @transform_7(%arg0: i32) -> (i32, i32) {
    %c0_i32 = arith.constant 0 : i32
    %c0_i32_0 = arith.constant 0 : i32
    %c0_i32_1 = arith.constant 0 : i32
    return %c0_i32, %c0_i32_0 : i32, i32
  }
  func.func @transform_8(%arg0: i32) -> (i32, i32) {
    %c0_i32 = arith.constant 0 : i32
    %c0_i32_0 = arith.constant 0 : i32
    %c0_i32_1 = arith.constant 0 : i32
    return %c0_i32, %c0_i32_0 : i32, i32
  }
  func.func @transform_9(%arg0: i32) -> (i32, i32) {
    %c0_i32 = arith.constant 0 : i32
    %c0_i32_0 = arith.constant 0 : i32
    return %arg0, %c0_i32 : i32, i32
  }
}

</mosaic_0001>

<bundles_post_ra>
// kernel: tpu_custom_call.1
= control target key start
LH: loop header
LB: loop body
LE: loop exit
PB: predicated region body
PF: predicated region fallthrough
CT: control target
= control target key end

     0   :  { %14 = vsyncpa [#allocation3], 0  ;;  %s2528_s0 = inlined_call_operand.hbm [shape: f32[8,8,16], index: 0, kind: input, shape index: {}]   ;;  %s2529_s1 = inlined_call_operand.hbm [shape: bf16[16,128], index: 1, kind: input, shape index: {}]   ;;  %s2530_s2 = inlined_call_operand.vmem [shape: bf16[32,128], index: 2, kind: input, shape index: {}]   ;;  %s2531_s3 = inlined_call_operand.vmem [shape: f32[1,128], index: 3, kind: input, shape index: {}]   ;;  %s2532_s4 = inlined_call_operand.vmem [shape: bf16[32,128], index: 4, kind: input, shape index: {}]   ;;  %s2533_s5 = inlined_call_operand.hbm [shape: bf16[32,128], index: 5, kind: input, shape index: {}]   ;;  %s2534_s6 = inlined_call_operand.vmem [shape: f32[1,128], index: 6, kind: input, shape index: {}]   ;;  %s2535_s7 = inlined_call_operand.vmem [shape: bf16[32,8], index: 7, kind: input, shape index: {}]   ;;  %s2536_s8 = inlined_call_operand.vmem [shape: f32[1,8], index: 8, kind: input, shape index: {}]   ;;  %s2537_s9 = inlined_call_operand.hbm [shape: f32[8,8], index: 9, kind: output, shape index: {}]  }
   0x1   :  { %15 = vsyncpa [#allocation6], 0 }
   0x2   :  { %16 = vsyncpa [#allocation4], 0  ;;  %s2087_s30 = smov [#allocation5]   ;;  %s1993_s13 = scalar_lea.hbm %s2529_s1, 128 }
   0x3   :  { %s34_s10 = sshll.u32 %s2087_s30, 4  ;;  %p1994_p0 = scmp.ne.s32.totalorder %s2529_s1, %s1993_s13  ;;  %s35_s10 = int_to_ptr.vmem [resolvable:$true] %s34_s10 }
   0x4   :  { %p1997_p1 = scmp.lt.u32.totalorder %s1993_s13, %s2529_s1 }
   0x6   :  { %p1999_p2 = pnand %p1997_p1, %p1994_p0 }
   0x8   :  { %2002 = shalt.err (!%p1999_p2)
}
   0x9   :  { %s2003_s18 = scalar_lea.vmem %s35_s10, 128  ;;  %p2008_p4 = scmp.lt.s32.totalorder %s35_s10, %s35_s10 }
   0xa   :  { %p2004_p3 = scmp.ne.s32.totalorder %s35_s10, %s2003_s18  ;;  %p2009_p5 = scmp.lt.s32.totalorder %s2003_s18, %s2003_s18 }
   0xc   :  { %p2010_p6 = por %p2009_p5, %p2008_p4 }
   0xe   :  { %p2011_p7 = pnand %p2010_p6, %p2004_p3 }
  0x10   :  { %2014 = shalt.err (!%p2011_p7)
}
  0x11   :  { %s2088_s19 = smov 64   ;;  %s2089_s20 = smov 4  }
  0x12   :  { %40 = dma.hbm_to_vmem [thread:$0]  %s2529_s1, 128, %s35_s10, [#allocation6], %s2088_s19, %s2088_s19, %s2089_s20  }
  0x13   :  { %s2090_s23 = smov [#allocation2]   ;;  %s2015_s27 = scalar_lea.hbm %s2528_s0, 1024 }
  0x14   :  { %s22_s24 = sshll.u32 %s2090_s23, 4  ;;  %p2016_p8 = scmp.ne.s32.totalorder %s2528_s0, %s2015_s27  ;;  %s23_s24 = int_to_ptr.vmem [resolvable:$true] %s22_s24 }
  0x15   :  { %p2019_p9 = scmp.lt.u32.totalorder %s2015_s27, %s2528_s0 }
  0x17   :  { %p2021_p10 = pnand %p2019_p9, %p2016_p8 }
  0x19   :  { %2024 = shalt.err (!%p2021_p10)
}
  0x1a   :  { %s2025_s12 = scalar_lea.vmem %s23_s24, 1024  ;;  %p2030_p12 = scmp.lt.s32.totalorder %s23_s24, %s23_s24 }
  0x1b   :  { %p2026_p11 = scmp.ne.s32.totalorder %s23_s24, %s2025_s12  ;;  %p2031_p13 = scmp.lt.s32.totalorder %s2025_s12, %s2025_s12 }
  0x1d   :  { %p2032_p0 = por %p2031_p13, %p2030_p12 }
  0x1f   :  { %p2033_p1 = pnand %p2032_p0, %p2026_p11 }
  0x21   :  { %2036 = shalt.err (!%p2033_p1)
}
  0x22   :  { %s2091_s1 = smov 128   ;;  %s2092_s10 = smov 8  }
  0x23   :  { %28 = dma.hbm_to_vmem [thread:$0]  %s2528_s0, 1024, %s23_s24, [#allocation3], %s2091_s1, %s2091_s1, %s2092_s10  }
  0x24   :  { %s2093_s15 = smov [#allocation7]   ;;  %s2037_s21 = scalar_lea.hbm %s2533_s5, 256 }
  0x25   :  { %s52_s16 = sshll.u32 %s2093_s15, 4  ;;  %p2038_p2 = scmp.ne.s32.totalorder %s2533_s5, %s2037_s21  ;;  %s53_s16 = int_to_ptr.vmem [resolvable:$true] %s52_s16 }
  0x26   :  { %p2041_p3 = scmp.lt.u32.totalorder %s2037_s21, %s2533_s5 }
  0x28   :  { %p2043_p4 = pnand %p2041_p3, %p2038_p2 }
  0x2a   :  { %2046 = shalt.err (!%p2043_p4)
}
  0x2b   :  { %s2047_s27 = scalar_lea.vmem %s53_s16, 256  ;;  %p2052_p6 = scmp.lt.s32.totalorder %s53_s16, %s53_s16 }
  0x2c   :  { %p2048_p5 = scmp.ne.s32.totalorder %s53_s16, %s2047_s27  ;;  %p2053_p7 = scmp.lt.s32.totalorder %s2047_s27, %s2047_s27 }
  0x2e   :  { %p2054_p8 = por %p2053_p7, %p2052_p6 }
  0x30   :  { %p2055_p9 = pnand %p2054_p8, %p2048_p5 }
  0x32   :  { %2058 = shalt.err (!%p2055_p9)
}
  0x33   :  { %58 = dma.hbm_to_vmem [thread:$0]  %s2533_s5, 256, %s53_s16, [#allocation6], %s2088_s19, %s2088_s19, %s2089_s20  }
  0x34   :  { %2081 = dma.done.wait [#allocation3], 1024  }
  0x35   :  { %2082 = vsyncadd [#allocation3], 4294966272 }
  0x36   :  { %2083 = dma.done.wait [#allocation6], 384  }
  0x37   :  { %2084 = vsyncadd [#allocation6], 4294966912  ;;  %v2094_v0 = vmov 0.0   ;;  %vm2095_vm0 = vmmov 0   ;;  %v1852_v1 = vld [vmem:[#allocation5] sm:$0xff]   ;;  %v76_v4 = vld [vmem:[#allocation2 + $0x8] sm:$0xff] }
  0x38   :  { %1692 = vmatprep.subr.bf16.mxu1 %v2094_v0  ;;  %1696 = vmatprep.mubr.msk.bf16.mxu1 %vm2095_vm0, %v2094_v0  ;;  %v2197_v2 = vld [vmem:[%s2530_s2] sm:$0xff]   ;;  %vm106_vm1 = vcmask 130048   ;;  %v77_v5 = vld [vmem:[#allocation2 + $0x10] sm:$0xff]  ;;  %v78_v7 = vld [vmem:[#allocation2 + $0x18] sm:$0xff]  ;;  %v2096_v10 = vmov 0   ;;  %vm196_vm2 = vcmask 261120  }
  0x39   :  { %1682 = vmatprep.subr.bf16.mxu0 %v1852_v1  ;;  %v75_v3 = vld [vmem:[#allocation2] sm:$0xff]  ;;  %1693 = vmatpush3.bf16.msra.mxu1 %v2197_v2  ;;  %v91_v8 = vpack.c.bf16 %v78_v7, %v77_v5  ;;  %v2204_v9 = vld [vmem:[%s2530_s2 + $0x8] sm:$0xff]   ;;  %v81_v55 = vld [vmem:[#allocation2 + $0x30] sm:$0xff]  ;;  %vm1540_vm3 = vcmask 64512  }
  0x3a   :  { %1683 = vmatpush3.bf16.msra.mxu0 %v1852_v1  ;;  %v90_v6 = vpack.c.bf16 %v76_v4, %v75_v3  ;;  %1694 = vmatprep.subr.bf16.mxu1 %v2094_v0  ;;  %v2225_v11 = vld [vmem:[%s2531_s3] ss:$0 sm:$0xff]  ;;  %s2097_s3 = smov 32   ;;  %v80_v54 = vld [vmem:[#allocation2 + $0x28] sm:$0xff]  ;;  %v82_v57 = vld [vmem:[#allocation2 + $0x38] sm:$0xff] }
  0x3b   :  { %1708 = vmatprep.subr.bf16.mxu0 %v2094_v0  ;;  %v79_v53 = vld [vmem:[#allocation2 + $0x20] sm:$0xff]  ;;  %v93_v58 = vpack.c.bf16 %v82_v57, %v81_v55 }
  0x3c   :  { %1684 = vmatprep.mubr.msk.bf16.mxu0 %vm106_vm1, %v90_v6  ;;  %v92_v56 = vpack.c.bf16 %v80_v54, %v79_v53 }
  0x3d   :  { %1685 = vmatmul.mubr.msk.bf16.vlgmr.msra.gmra.mrb[0].mxu0 %vm106_vm1, %v91_v8  ;;  %1695 = vmatpush3.bf16.msra.mxu1 %v2204_v9 }
  0x3e   :  { %1709 = vmatpush3.bf16.msra.mxu0 %v2197_v2  ;;  %1700 = vmatprep.subr.bf16.mxu1 %v2094_v0 }
  0x3f   :  { %1710 = vmatprep.subr.bf16.mxu0 %v2094_v0  ;;  %1688 = vmatprep.mubr.msk.bf16.mxu0 %vm106_vm1, %v92_v56 }
  0x40   :  { %1697 = vmatmul.mubr.bf16.vlgmr.msra.gmra.mrb[0].mxu1 %v2096_v10 }
  0x41   :  { %1701 = vmatpush3.bf16.msra.mxu1 %v2197_v2  ;;  %1704 = vmatprep.mubr.msk.bf16.mxu1 %vm2095_vm0, %v2094_v0 }
  0x42   :  { %1702 = vmatprep.subr.bf16.mxu1 %v2094_v0  ;;  %1711 = vmatpush3.bf16.msra.mxu0 %v2204_v9 }
  0x43   :  { %1724 = vmatprep.subr.bf16.mxu0 %v2094_v0 }
  0x45   :  { %1703 = vmatpush3.bf16.msra.mxu1 %v2204_v9  ;;  %1689 = vmatmul.mubr.msk.bf16.gmra.mrb[4].mxu0 %vm106_vm1, %v93_v58 }
  0x46   :  { %1716 = vmatprep.subr.bf16.mxu1 %v2094_v0  ;;  %1712 = vmatprep.mubr.msk.bf16.mxu0 %vm2095_vm0, %v2094_v0 }
 0x110   :  { %v2227_v12 = vpop.f32.mrb[0].mxu0 }
 0x111   :  { %v153_v13 = vpop.f32.mrb[1].mxu0  ;;  %v162_v6 = vadd.f32 %v2227_v12, %v2225_v11 }
 0x112   :  { %v154_v14 = vadd.f32 %v2225_v11, %v153_v13  ;;  %v2230_v15 = vpop.f32.mrb[2].mxu0 }
 0x113   :  { %v156_v16 = vpop.f32.mrb[3].mxu0  ;;  %v234_v17 = vpop.f32.mrb[0].mxu1 }
 0x114   :  { %v240_v18 = vadd.f32 %v234_v17, %v154_v14  ;;  %v1698_v19 = vpop.f32.mrb[1].mxu1  ;;  %v157_v37 = vadd.f32 %v2225_v11, %v156_v16 }
 0x115   :  { %v237_v20 = vpop.f32.mrb[2].mxu1 }
 0x116   :  { %v1699_v21 = vpop.f32.mrb[3].mxu1  ;;  %1861 = vtanh.f32 %v240_v18  ;;  %v1577_v23 = vmul.f32 -1.442695, %v240_v18 }
 0x118   :  { %1863 = vpow2.f32 %v1577_v23  ;;  %v2260_v63 = vpop.f32.mrb[4].mxu0 }
 0x119   :  { %v2262_v1 = vpop.f32.mrb[5].mxu0 }
 0x11a   :  { %v2264_v3 = vpop.f32.mrb[6].mxu0 }
 0x11b   :  { %v2266_v4 = vpop.f32.mrb[7].mxu0 }
 0x120   :  { %v1862_v22 = vpop.eup %1861 }
 0x121   :  { %250 = vrot.lane.b32.xlu0 %v1862_v22, %s2088_s19 }
 0x122   :  { %v1864_v24 = vpop.eup %1863 }
 0x123   :  { %v244_v25 = vadd.f32 1.0, %v1864_v24 }
 0x125   :  { %1865 = vrcp.f32 %v244_v25 }
 0x12f   :  { %v1866_v26 = vpop.eup %1865 }
 0x130   :  { %v248_v29 = vmul.f32 0.0, %v1866_v26 }
 0x193   :  { %v251_v27 = vpop.permute.xlu0 %250 }
 0x194   :  { %v253_v28 = vmul.f32 %v1866_v26, %v251_v27 }
 0x196   :  { %255 = vrot.lane.b32.xlu0 %v253_v28, %s2097_s3 }
 0x208   :  { %v256_v30 = vpop.permute.xlu0 %255 }
 0x209   :  { %v258_v31 = vadd.f32 %v256_v30, %v248_v29 }
 0x20b   :  { %1867 = vtanh.f32 %v258_v31 }
 0x215   :  { %v1868_v32 = vpop.eup %1867 }
 0x216   :  { %261 = vrot.lane.b32.xlu1 %v1868_v32, %s2088_s19 }
 0x288   :  { %v262_v33 = vpop.permute.xlu1 %261 }
 0x289   :  { %v2235_v34 = vmul.f32 %v1866_v26, %v262_v33 }
 0x28b   :  { %v265_v35 = vpack.c.bf16 %v2235_v34, %v2235_v34 }
 0x28d   :  { %267 = vrot.lane.b32.xlu1 %v265_v35, %s2097_s3 }
 0x2ff   :  { %v268_v36 = vpop.permute.xlu1 %267 }
 0x300   :  { %1705 = vmatmul.mubr.msk.bf16.vlgmr.msra.gmra.mrb[4].mxu1 %vm196_vm2, %v268_v36 }
 0x301   :  { %1717 = vmatpush3.bf16.msra.mxu1 %v2197_v2  ;;  %1720 = vmatprep.mubr.msk.bf16.mxu1 %vm2095_vm0, %v2094_v0 }
 0x302   :  { %1718 = vmatprep.subr.bf16.mxu1 %v2094_v0 }
 0x305   :  { %1719 = vmatpush3.bf16.msra.mxu1 %v2204_v9 }
 0x306   :  { %1732 = vmatprep.subr.bf16.mxu1 %v2094_v0 }
 0x3d3   :  { %v306_v38 = vpop.f32.mrb[4].mxu1 }
 0x3d4   :  { %v312_v39 = vadd.f32 %v306_v38, %v157_v37  ;;  %v1706_v40 = vpop.f32.mrb[5].mxu1 }
 0x3d5   :  { %v309_v41 = vpop.f32.mrb[6].mxu1 }
 0x3d6   :  { %1869 = vtanh.f32 %v312_v39  ;;  %v1707_v42 = vpop.f32.mrb[7].mxu1  ;;  %v1579_v44 = vmul.f32 -1.442695, %v312_v39 }
 0x3d8   :  { %1871 = vpow2.f32 %v1579_v44 }
 0x3e0   :  { %v1870_v43 = vpop.eup %1869 }
 0x3e1   :  { %322 = vrot.lane.b32.xlu0 %v1870_v43, %s2088_s19 }
 0x3e2   :  { %v1872_v45 = vpop.eup %1871 }
 0x3e3   :  { %v316_v46 = vadd.f32 1.0, %v1872_v45 }
 0x3e5   :  { %1873 = vrcp.f32 %v316_v46 }
 0x3ef   :  { %v1874_v47 = vpop.eup %1873 }
 0x3f0   :  { %v320_v50 = vmul.f32 %v1874_v47, %v258_v31  ;;  %v165_v31 = vadd.f32 %v2230_v15, %v2225_v11 }
 0x453   :  { %v323_v48 = vpop.permute.xlu0 %322 }
 0x454   :  { %v325_v49 = vmul.f32 %v1874_v47, %v323_v48 }
 0x456   :  { %327 = vrot.lane.b32.xlu1 %v325_v49, %s2097_s3 }
 0x4c8   :  { %v328_v51 = vpop.permute.xlu1 %327 }
 0x4c9   :  { %v330_v52 = vadd.f32 %v328_v51, %v320_v50 }
 0x4cb   :  { %1875 = vtanh.f32 %v330_v52 }
 0x4d5   :  { %v1876_v59 = vpop.eup %1875 }
 0x4d6   :  { %333 = vrot.lane.b32.xlu0 %v1876_v59, %s2088_s19 }
 0x548   :  { %v334_v60 = vpop.permute.xlu0 %333 }
 0x549   :  { %v2255_v61 = vmul.f32 %v1874_v47, %v334_v60 }
 0x54b   :  { %v337_v62 = vpack.c.bf16 %v2255_v61, %v2255_v61 }
 0x54d   :  { %339 = vrot.lane.b32.xlu1 %v337_v62, %s2097_s3 }
 0x5bf   :  { %v340_v5 = vpop.permute.xlu1 %339 }
 0x5c0   :  { %1713 = vmatmul.mubr.msk.bf16.vlgmr.msra.gmra.mrb[8].mxu0 %vm196_vm2, %v340_v5 }
 0x5c1   :  { %1725 = vmatpush3.bf16.msra.mxu0 %v2197_v2  ;;  %1728 = vmatprep.mubr.msk.bf16.mxu0 %vm2095_vm0, %v2094_v0 }
 0x5c2   :  { %1726 = vmatprep.subr.bf16.mxu0 %v2094_v0 }
 0x5c5   :  { %1727 = vmatpush3.bf16.msra.mxu0 %v2204_v9 }
 0x5c6   :  { %1740 = vmatprep.subr.bf16.mxu0 %v2094_v0 }
 0x693   :  { %v378_v7 = vpop.f32.mrb[8].mxu0 }
 0x694   :  { %v384_v8 = vadd.f32 %v378_v7, %v162_v6  ;;  %v1714_v13 = vpop.f32.mrb[9].mxu0 }
 0x695   :  { %v381_v14 = vpop.f32.mrb[10].mxu0 }
 0x696   :  { %1877 = vtanh.f32 %v384_v8  ;;  %v1715_v16 = vpop.f32.mrb[11].mxu0  ;;  %v1581_v18 = vmul.f32 -1.442695, %v384_v8 }
 0x698   :  { %1879 = vpow2.f32 %v1581_v18 }
 0x6a0   :  { %v1878_v17 = vpop.eup %1877 }
 0x6a1   :  { %394 = vrot.lane.b32.xlu0 %v1878_v17, %s2088_s19 }
 0x6a2   :  { %v1880_v19 = vpop.eup %1879 }
 0x6a3   :  { %v388_v20 = vadd.f32 1.0, %v1880_v19 }
 0x6a5   :  { %1881 = vrcp.f32 %v388_v20  ;;  %v173_v20 = vadd.f32 %v2225_v11, %v2266_v4 }
 0x6af   :  { %v1882_v21 = vpop.eup %1881 }
 0x6b0   :  { %v392_v12 = vmul.f32 %v1882_v21, %v330_v52  ;;  %v170_v52 = vadd.f32 %v2225_v11, %v2262_v1 }
 0x713   :  { %v395_v22 = vpop.permute.xlu0 %394 }
 0x714   :  { %v397_v23 = vmul.f32 %v1882_v21, %v395_v22 }
 0x716   :  { %399 = vrot.lane.b32.xlu1 %v397_v23, %s2097_s3 }
 0x788   :  { %v400_v24 = vpop.permute.xlu1 %399 }
 0x789   :  { %v402_v25 = vadd.f32 %v400_v24, %v392_v12 }
 0x78b   :  { %1883 = vtanh.f32 %v402_v25 }
 0x795   :  { %v1884_v26 = vpop.eup %1883 }
 0x796   :  { %405 = vrot.lane.b32.xlu0 %v1884_v26, %s2088_s19 }
 0x808   :  { %v406_v27 = vpop.permute.xlu0 %405 }
 0x809   :  { %v2280_v28 = vmul.f32 %v1882_v21, %v406_v27 }
 0x80b   :  { %v409_v29 = vpack.c.bf16 %v2280_v28, %v2280_v28 }
 0x80d   :  { %411 = vrot.lane.b32.xlu1 %v409_v29, %s2097_s3 }
 0x87f   :  { %v412_v30 = vpop.permute.xlu1 %411 }
 0x880   :  { %1721 = vmatmul.mubr.msk.bf16.vlgmr.msra.gmra.mrb[8].mxu1 %vm196_vm2, %v412_v30 }
 0x881   :  { %1733 = vmatpush3.bf16.msra.mxu1 %v2197_v2  ;;  %1736 = vmatprep.mubr.msk.bf16.mxu1 %vm2095_vm0, %v2094_v0 }
 0x882   :  { %1734 = vmatprep.subr.bf16.mxu1 %v2094_v0 }
 0x885   :  { %1735 = vmatpush3.bf16.msra.mxu1 %v2204_v9 }
 0x886   :  { %1748 = vmatprep.subr.bf16.mxu1 %v2094_v0 }
 0x953   :  { %v450_v32 = vpop.f32.mrb[8].mxu1 }
 0x954   :  { %v456_v33 = vadd.f32 %v450_v32, %v165_v31  ;;  %v1722_v35 = vpop.f32.mrb[9].mxu1 }
 0x955   :  { %v453_v36 = vpop.f32.mrb[10].mxu1 }
 0x956   :  { %1885 = vtanh.f32 %v456_v33  ;;  %v1723_v37 = vpop.f32.mrb[11].mxu1  ;;  %v1583_v39 = vmul.f32 -1.442695, %v456_v33 }
 0x958   :  { %1887 = vpow2.f32 %v1583_v39  ;;  %v178_v39 = vadd.f32 %v2260_v63, %v2225_v11 }
 0x960   :  { %v1886_v38 = vpop.eup %1885 }
 0x961   :  { %466 = vrot.lane.b32.xlu0 %v1886_v38, %s2088_s19 }
 0x962   :  { %v1888_v40 = vpop.eup %1887 }
 0x963   :  { %v460_v41 = vadd.f32 1.0, %v1888_v40 }
 0x965   :  { %1889 = vrcp.f32 %v460_v41 }
 0x96f   :  { %v1890_v42 = vpop.eup %1889 }
 0x970   :  { %v464_v15 = vmul.f32 %v1890_v42, %v402_v25 }
 0x9d3   :  { %v467_v43 = vpop.permute.xlu0 %466 }
 0x9d4   :  { %v469_v44 = vmul.f32 %v1890_v42, %v467_v43 }
 0x9d6   :  { %471 = vrot.lane.b32.xlu1 %v469_v44, %s2097_s3 }
 0xa48   :  { %v472_v45 = vpop.permute.xlu1 %471 }
 0xa49   :  { %v474_v46 = vadd.f32 %v472_v45, %v464_v15 }
 0xa4b   :  { %1891 = vtanh.f32 %v474_v46 }
 0xa55   :  { %v1892_v47 = vpop.eup %1891 }
 0xa56   :  { %477 = vrot.lane.b32.xlu0 %v1892_v47, %s2088_s19 }
 0xac8   :  { %v478_v48 = vpop.permute.xlu0 %477 }
 0xac9   :  { %v2297_v49 = vmul.f32 %v1890_v42, %v478_v48 }
 0xacb   :  { %v481_v50 = vpack.c.bf16 %v2297_v49, %v2297_v49 }
 0xacd   :  { %483 = vrot.lane.b32.xlu1 %v481_v50, %s2097_s3 }
 0xb3f   :  { %v484_v51 = vpop.permute.xlu1 %483 }
 0xb40   :  { %1729 = vmatmul.mubr.msk.bf16.vlgmr.msra.gmra.mrb[12].mxu0 %vm196_vm2, %v484_v51 }
 0xb41   :  { %1741 = vmatpush3.bf16.msra.mxu0 %v2197_v2  ;;  %1744 = vmatprep.mubr.msk.bf16.mxu0 %vm2095_vm0, %v2094_v0 }
 0xb42   :  { %1742 = vmatprep.subr.bf16.mxu0 %v2094_v0 }
 0xb45   :  { %1743 = vmatpush3.bf16.msra.mxu0 %v2204_v9 }
 0xc13   :  { %v522_v53 = vpop.f32.mrb[12].mxu0 }
 0xc14   :  { %v528_v54 = vadd.f32 %v522_v53, %v170_v52  ;;  %v1730_v55 = vpop.f32.mrb[13].mxu0 }
 0xc15   :  { %v525_v56 = vpop.f32.mrb[14].mxu0 }
 0xc16   :  { %1893 = vtanh.f32 %v528_v54  ;;  %v1731_v57 = vpop.f32.mrb[15].mxu0  ;;  %v1585_v59 = vmul.f32 -1.442695, %v528_v54  ;;  %v1855_v54 = vld [vmem:[%s2532_s4] sm:$0xff]   ;;  %v778_v56 = vpack.c.bf16 %v2255_v61, %v2235_v34  ;;  %v779_v34 = vpack.c.bf16 %v2297_v49, %v2280_v28  ;;  %v2363_v61 = vld [vmem:[#allocation7] sm:$0xff]  }
 0xc17   :  { %1756 = vmatprep.subr.bf16.mxu0 %v1855_v54  ;;  %v1856_v57 = vld [vmem:[%s2532_s4 + $0x8] sm:$0xff]   ;;  %v181_v28 = vadd.f32 %v2264_v3, %v2225_v11 }
 0xc18   :  { %1895 = vpow2.f32 %v1585_v59 }
 0xc20   :  { %v1894_v58 = vpop.eup %1893 }
 0xc21   :  { %538 = vrot.lane.b32.xlu0 %v1894_v58, %s2088_s19 }
 0xc22   :  { %v1896_v60 = vpop.eup %1895 }
 0xc23   :  { %v532_v62 = vadd.f32 1.0, %v1896_v60 }
 0xc25   :  { %1897 = vrcp.f32 %v532_v62 }
 0xc2f   :  { %v1898_v5 = vpop.eup %1897 }
 0xc30   :  { %v536_v1 = vmul.f32 %v1898_v5, %v474_v46 }
 0xc93   :  { %v539_v6 = vpop.permute.xlu0 %538 }
 0xc94   :  { %v541_v7 = vmul.f32 %v1898_v5, %v539_v6  ;;  %v2367_v6 = vld [vmem:[#allocation7 + $0x8] sm:$0xff]  }
 0xc96   :  { %543 = vrot.lane.b32.xlu1 %v541_v7, %s2097_s3 }
 0xd08   :  { %v544_v8 = vpop.permute.xlu1 %543 }
 0xd09   :  { %v546_v13 = vadd.f32 %v544_v8, %v536_v1 }
 0xd0b   :  { %1899 = vtanh.f32 %v546_v13 }
 0xd15   :  { %v1900_v14 = vpop.eup %1899 }
 0xd16   :  { %549 = vrot.lane.b32.xlu0 %v1900_v14, %s2088_s19  ;;  %v2391_v14 = vld [vmem:[%s2534_s6] ss:$0 sm:$0xff] }
 0xd88   :  { %v550_v16 = vpop.permute.xlu0 %549 }
 0xd89   :  { %v2313_v17 = vmul.f32 %v1898_v5, %v550_v16 }
 0xd8b   :  { %v553_v18 = vpack.c.bf16 %v2313_v17, %v2313_v17 }
 0xd8d   :  { %555 = vrot.lane.b32.xlu1 %v553_v18, %s2097_s3 }
 0xdff   :  { %v556_v19 = vpop.permute.xlu1 %555 }
 0xe00   :  { %1737 = vmatmul.mubr.msk.bf16.vlgmr.msra.gmra.mrb[12].mxu1 %vm196_vm2, %v556_v19 }
 0xe01   :  { %1749 = vmatpush3.bf16.msra.mxu1 %v2197_v2  ;;  %1752 = vmatprep.mubr.msk.bf16.mxu1 %vm2095_vm0, %v2094_v0 }
 0xe02   :  { %1750 = vmatprep.subr.bf16.mxu1 %v2094_v0 }
 0xe05   :  { %1751 = vmatpush3.bf16.msra.mxu1 %v2204_v9 }
 0xe06   :  { %1768 = vmatprep.subr.bf16.mxu1 %v2094_v0 }
 0xed3   :  { %v594_v21 = vpop.f32.mrb[12].mxu1 }
 0xed4   :  { %v600_v22 = vadd.f32 %v594_v21, %v173_v20  ;;  %v1738_v23 = vpop.f32.mrb[13].mxu1 }
 0xed5   :  { %v597_v12 = vpop.f32.mrb[14].mxu1 }
 0xed6   :  { %1901 = vtanh.f32 %v600_v22  ;;  %v1739_v24 = vpop.f32.mrb[15].mxu1  ;;  %v1587_v2 = vmul.f32 -1.442695, %v600_v22 }
 0xed8   :  { %1903 = vpow2.f32 %v1587_v2 }
 0xee0   :  { %v1902_v25 = vpop.eup %1901 }
 0xee1   :  { %610 = vrot.lane.b32.xlu0 %v1902_v25, %s2088_s19 }
 0xee2   :  { %v1904_v26 = vpop.eup %1903 }
 0xee3   :  { %v604_v27 = vadd.f32 1.0, %v1904_v26 }
 0xee5   :  { %1905 = vrcp.f32 %v604_v27 }
 0xeef   :  { %v1906_v9 = vpop.eup %1905 }
 0xef0   :  { %v608_v4 = vmul.f32 %v1906_v9, %v546_v13 }
 0xf53   :  { %v611_v29 = vpop.permute.xlu0 %610 }
 0xf54   :  { %v613_v30 = vmul.f32 %v1906_v9, %v611_v29 }
 0xf56   :  { %615 = vrot.lane.b32.xlu1 %v613_v30, %s2097_s3 }
 0xfc8   :  { %v616_v31 = vpop.permute.xlu1 %615 }
 0xfc9   :  { %v618_v32 = vadd.f32 %v616_v31, %v608_v4 }
 0xfcb   :  { %1907 = vtanh.f32 %v618_v32 }
 0xfd5   :  { %v1908_v33 = vpop.eup %1907 }
 0xfd6   :  { %621 = vrot.lane.b32.xlu0 %v1908_v33, %s2088_s19 }
0x1048   :  { %v622_v35 = vpop.permute.xlu0 %621 }
0x1049   :  { %v2330_v36 = vmul.f32 %v1906_v9, %v622_v35 }
0x104b   :  { %v625_v37 = vpack.c.bf16 %v2330_v36, %v2330_v36 }
0x104d   :  { %627 = vrot.lane.b32.xlu1 %v625_v37, %s2097_s3 }
0x10bf   :  { %v628_v38 = vpop.permute.xlu1 %627 }
0x10c0   :  { %1745 = vmatmul.mubr.msk.bf16.vlgmr.msra.gmra.mrb[16].mxu0 %vm196_vm2, %v628_v38 }
0x10c1   :  { %1757 = vmatpush3.bf16.msra.mxu0 %v1855_v54 }
0x10c2   :  { %1758 = vmatprep.subr.bf16.mxu0 %v1856_v57 }
0x10c5   :  { %1759 = vmatpush3.bf16.msra.mxu0 %v1856_v57 }
0x10c6   :  { %1784 = vmatprep.subr.bf16.mxu0 %v2094_v0 }
0x1193   :  { %v666_v40 = vpop.f32.mrb[16].mxu0 }
0x1194   :  { %v672_v41 = vadd.f32 %v666_v40, %v178_v39  ;;  %v1746_v42 = vpop.f32.mrb[17].mxu0 }
0x1195   :  { %v669_v43 = vpop.f32.mrb[18].mxu0 }
0x1196   :  { %1909 = vtanh.f32 %v672_v41  ;;  %v1747_v44 = vpop.f32.mrb[19].mxu0  ;;  %v1589_v45 = vmul.f32 -1.442695, %v672_v41 }
0x1198   :  { %1911 = vpow2.f32 %v1589_v45 }
0x11a0   :  { %v1910_v15 = vpop.eup %1909 }
0x11a1   :  { %682 = vrot.lane.b32.xlu0 %v1910_v15, %s2088_s19 }
0x11a2   :  { %v1912_v46 = vpop.eup %1911 }
0x11a3   :  { %v676_v47 = vadd.f32 1.0, %v1912_v46 }
0x11a5   :  { %1913 = vrcp.f32 %v676_v47 }
0x11af   :  { %v1914_v48 = vpop.eup %1913 }
0x11b0   :  { %v680_v63 = vmul.f32 %v1914_v48, %v618_v32 }
0x1213   :  { %v683_v50 = vpop.permute.xlu0 %682 }
0x1214   :  { %v685_v51 = vmul.f32 %v1914_v48, %v683_v50  ;;  %v780_v50 = vpack.c.bf16 %v2330_v36, %v2313_v17 }
0x1216   :  { %687 = vrot.lane.b32.xlu1 %v685_v51, %s2097_s3 }
0x1288   :  { %v688_v52 = vpop.permute.xlu1 %687 }
0x1289   :  { %v2340_v53 = vadd.f32 %v688_v52, %v680_v63 }
0x128b   :  { %1915 = vtanh.f32 %v2340_v53 }
0x1295   :  { %v1916_v55 = vpop.eup %1915 }
0x1296   :  { %693 = vrot.lane.b32.xlu0 %v1916_v55, %s2088_s19 }
0x129a   :  { %792 = vrot.lane.b32.xlu0 %v778_v56, %s2097_s3 }
0x1308   :  { %v694_v58 = vpop.permute.xlu0 %693 }
0x1309   :  { %v2354_v59 = vmul.f32 %v1914_v48, %v694_v58 }
0x130b   :  { %v697_v60 = vpack.c.bf16 %v2354_v59, %v2354_v59 }
0x130c   :  { %v793_v62 = vpop.permute.xlu0 %792 }
0x130d   :  { %699 = vrot.lane.b32.xlu1 %v697_v60, %s2097_s3  ;;  %1760 = vmatprep.mubr.msk.bf16.mxu0 %vm196_vm2, %v793_v62 }
0x1311   :  { %794 = vrot.lane.b32.xlu1 %v779_v34, %s2097_s3 }
0x137f   :  { %v700_v5 = vpop.permute.xlu1 %699 }
0x1380   :  { %1753 = vmatmul.mubr.msk.bf16.vlgmr.msra.gmra.mrb[16].mxu1 %vm196_vm2, %v700_v5 }
0x1381   :  { %1769 = vmatpush3.bf16.msra.mxu1 %v2363_v61  ;;  %1772 = vmatprep.mubr.msk.bf16.mxu1 %vm2095_vm0, %v2094_v0 }
0x1382   :  { %1770 = vmatprep.subr.bf16.mxu1 %v2094_v0 }
0x1383   :  { %v795_v7 = vpop.permute.xlu1 %794 }
0x1384   :  { %1761 = vmatmul.mubr.msk.bf16.vlgmr.msra.gmra.mrb[20].mxu0 %vm196_vm2, %v795_v7 }
0x1385   :  { %1771 = vmatpush3.bf16.msra.mxu1 %v2367_v6  ;;  %1785 = vmatpush3.bf16.msra.mxu0 %v2363_v61 }
0x1386   :  { %1776 = vmatprep.subr.bf16.mxu1 %v2094_v0  ;;  %1786 = vmatprep.subr.bf16.mxu0 %v2094_v0 }
0x1388   :  { %1773 = vmatmul.mubr.bf16.vlgmr.msra.gmra.mrb[20].mxu1 %v2096_v10 }
0x1389   :  { %1777 = vmatpush3.bf16.msra.mxu1 %v2363_v61  ;;  %1780 = vmatprep.mubr.msk.bf16.mxu1 %vm2095_vm0, %v2094_v0 }
0x138a   :  { %1778 = vmatprep.subr.bf16.mxu1 %v2094_v0  ;;  %1787 = vmatpush3.bf16.msra.mxu0 %v2367_v6 }
0x138b   :  { %1800 = vmatprep.subr.bf16.mxu0 %v2094_v0 }
0x138d   :  { %1779 = vmatpush3.bf16.msra.mxu1 %v2367_v6 }
0x138e   :  { %1792 = vmatprep.subr.bf16.mxu1 %v2094_v0 }
0x1453   :  { %v738_v49 = vpop.f32.mrb[16].mxu1 }
0x1454   :  { %v744_v10 = vadd.f32 %v738_v49, %v181_v28  ;;  %v1754_v1 = vpop.f32.mrb[17].mxu1 }
0x1455   :  { %v741_v8 = vpop.f32.mrb[18].mxu1 }
0x1456   :  { %v1755_v13 = vpop.f32.mrb[19].mxu1  ;;  %v1591_v35 = vmul.f32 -1.442695, %v744_v10 }
0x1457   :  { %v2393_v16 = vpop.f32.mrb[20].mxu0 }
0x1458   :  { %v858_v18 = vpop.f32.mrb[21].mxu0 }
0x1459   :  { %v859_v19 = vadd.f32 %v2391_v14, %v858_v18  ;;  %v2396_v20 = vpop.f32.mrb[22].mxu0 }
0x145a   :  { %v861_v21 = vpop.f32.mrb[23].mxu0 }
0x145b   :  { %v935_v22 = vpop.f32.mrb[20].mxu1  ;;  %v862_v52 = vadd.f32 %v2391_v14, %v861_v21 }
0x145c   :  { %v941_v11 = vadd.f32 %v935_v22, %v859_v19  ;;  %v1774_v3 = vpop.f32.mrb[21].mxu1 }
0x145d   :  { %v938_v23 = vpop.f32.mrb[22].mxu1 }
0x145e   :  { %1917 = vtanh.f32 %v941_v11  ;;  %v1775_v12 = vpop.f32.mrb[23].mxu1  ;;  %v1601_v25 = vmul.f32 -1.442695, %v941_v11 }
0x145f   :  { %v867_v12 = vadd.f32 %v2393_v16, %v2391_v14 }
0x1460   :  { %1919 = vpow2.f32 %v1601_v25 }
0x1468   :  { %v1918_v24 = vpop.eup %1917 }
0x1469   :  { %951 = vrot.lane.b32.xlu0 %v1918_v24, %s2088_s19 }
0x146a   :  { %v1920_v2 = vpop.eup %1919 }
0x146b   :  { %v945_v26 = vadd.f32 1.0, %v1920_v2 }
0x146d   :  { %1921 = vrcp.f32 %v945_v26 }
0x1477   :  { %v1922_v27 = vpop.eup %1921 }
0x1478   :  { %v949_v30 = vmul.f32 0.0, %v1922_v27 }
0x14db   :  { %v952_v9 = vpop.permute.xlu0 %951 }
0x14dc   :  { %v954_v29 = vmul.f32 %v1922_v27, %v952_v9 }
0x14de   :  { %956 = vrot.lane.b32.xlu1 %v954_v29, %s2097_s3 }
0x1550   :  { %v957_v4 = vpop.permute.xlu1 %956 }
0x1551   :  { %v959_v31 = vadd.f32 %v957_v4, %v949_v30 }
0x1553   :  { %1923 = vtanh.f32 %v959_v31 }
0x1554   :  { %1925 = vtanh.f32 %v744_v10 }
0x1555   :  { %1927 = vpow2.f32 %v1591_v35 }
0x155d   :  { %v1924_v32 = vpop.eup %1923 }
0x155e   :  { %962 = vrot.lane.b32.xlu0 %v1924_v32, %s2088_s19  ;;  %v1926_v33 = vpop.eup %1925 }
0x155f   :  { %v1928_v37 = vpop.eup %1927 }
0x1560   :  { %v748_v38 = vadd.f32 1.0, %v1928_v37 }
0x1562   :  { %754 = vrot.lane.b32.xlu0 %v1926_v33, %s2088_s19  ;;  %1929 = vrcp.f32 %v748_v38 }
0x156c   :  { %v1930_v42 = vpop.eup %1929 }
0x156d   :  { %v752_v45 = vmul.f32 %v1930_v42, %v2340_v53 }
0x15d0   :  { %v963_v39 = vpop.permute.xlu0 %962 }
0x15d1   :  { %v965_v40 = vmul.f32 %v1922_v27, %v963_v39 }
0x15d3   :  { %v966_v41 = vpack.c.bf16 %v965_v40, %v965_v40 }
0x15d4   :  { %v755_v43 = vpop.permute.xlu0 %754 }
0x15d5   :  { %v757_v44 = vmul.f32 %v1930_v42, %v755_v43  ;;  %968 = vrot.lane.b32.xlu1 %v966_v41, %s2097_s3  ;;  %v870_v43 = vadd.f32 %v2396_v20, %v2391_v14 }
0x15d7   :  { %759 = vrot.lane.b32.xlu0 %v757_v44, %s2097_s3 }
0x1647   :  { %v969_v15 = vpop.permute.xlu1 %968 }
0x1648   :  { %1781 = vmatmul.mubr.msk.bf16.vlgmr.msra.gmra.mrb[24].mxu1 %vm196_vm2, %v969_v15 }
0x1649   :  { %v760_v46 = vpop.permute.xlu0 %759  ;;  %1793 = vmatpush3.bf16.msra.mxu1 %v2363_v61  ;;  %1796 = vmatprep.mubr.msk.bf16.mxu1 %vm2095_vm0, %v2094_v0 }
0x164a   :  { %v762_v47 = vadd.f32 %v760_v46, %v752_v45  ;;  %1794 = vmatprep.subr.bf16.mxu1 %v2094_v0 }
0x164c   :  { %1931 = vtanh.f32 %v762_v47 }
0x164d   :  { %1795 = vmatpush3.bf16.msra.mxu1 %v2367_v6 }
0x164e   :  { %1808 = vmatprep.subr.bf16.mxu1 %v2094_v0 }
0x1656   :  { %v1932_v48 = vpop.eup %1931 }
0x1657   :  { %765 = vrot.lane.b32.xlu0 %v1932_v48, %s2088_s19 }
0x165b   :  { %796 = vrot.lane.b32.xlu0 %v780_v50, %s2097_s3 }
0x16c9   :  { %v766_v51 = vpop.permute.xlu0 %765 }
0x16ca   :  { %v768_v10 = vmul.f32 %v1930_v42, %v766_v51 }
0x16cc   :  { %v781_v8 = vpack.c.bf16 %v768_v10, %v2354_v59 }
0x16cd   :  { %v797_v63 = vpop.permute.xlu0 %796 }
0x16ce   :  { %1764 = vmatprep.mubr.msk.bf16.mxu0 %vm196_vm2, %v797_v63 }
0x171b   :  { %v1007_v53 = vpop.f32.mrb[24].mxu1 }
0x171c   :  { %v1013_v54 = vadd.f32 %v1007_v53, %v862_v52  ;;  %v1782_v55 = vpop.f32.mrb[25].mxu1 }
0x171d   :  { %v1010_v56 = vpop.f32.mrb[26].mxu1 }
0x171e   :  { %1933 = vtanh.f32 %v1013_v54  ;;  %v1783_v57 = vpop.f32.mrb[27].mxu1  ;;  %v1603_v60 = vmul.f32 -1.442695, %v1013_v54 }
0x1720   :  { %1935 = vpow2.f32 %v1603_v60 }
0x1728   :  { %v1934_v58 = vpop.eup %1933 }
0x1729   :  { %1023 = vrot.lane.b32.xlu1 %v1934_v58, %s2088_s19 }
0x172a   :  { %v1936_v17 = vpop.eup %1935 }
0x172b   :  { %v1017_v36 = vadd.f32 1.0, %v1936_v17 }
0x172d   :  { %1937 = vrcp.f32 %v1017_v36 }
0x1737   :  { %v1938_v62 = vpop.eup %1937 }
0x1738   :  { %v1021_v7 = vmul.f32 %v1938_v62, %v959_v31 }
0x179b   :  { %v1024_v34 = vpop.permute.xlu1 %1023 }
0x179c   :  { %v1026_v5 = vmul.f32 %v1938_v62, %v1024_v34 }
0x179e   :  { %1028 = vrot.lane.b32.xlu1 %v1026_v5, %s2097_s3 }
0x1810   :  { %v1029_v28 = vpop.permute.xlu1 %1028 }
0x1811   :  { %v1031_v49 = vadd.f32 %v1029_v28, %v1021_v7 }
0x1813   :  { %1939 = vtanh.f32 %v1031_v49 }
0x181d   :  { %v1940_v1 = vpop.eup %1939 }
0x181e   :  { %1034 = vrot.lane.b32.xlu1 %v1940_v1, %s2088_s19 }
0x1822   :  { %798 = vrot.lane.b32.xlu1 %v781_v8, %s2097_s3 }
0x1890   :  { %v1035_v13 = vpop.permute.xlu1 %1034 }
0x1891   :  { %v1037_v18 = vmul.f32 %v1938_v62, %v1035_v13 }
0x1893   :  { %v1038_v19 = vpack.c.bf16 %v1037_v18, %v1037_v18 }
0x1894   :  { %v799_v21 = vpop.permute.xlu1 %798 }
0x1895   :  { %1040 = vrot.lane.b32.xlu0 %v1038_v19, %s2097_s3  ;;  %1765 = vmatmul.mubr.msk.bf16.gmra.mrb[24].mxu0 %vm196_vm2, %v799_v21 }
0x1896   :  { %1788 = vmatprep.mubr.msk.bf16.mxu0 %vm2095_vm0, %v2094_v0 }
0x1907   :  { %v1041_v22 = vpop.permute.xlu0 %1040 }
0x1908   :  { %1789 = vmatmul.mubr.msk.bf16.vlgmr.msra.gmra.mrb[28].mxu0 %vm196_vm2, %v1041_v22 }
0x1909   :  { %1801 = vmatpush3.bf16.msra.mxu0 %v2363_v61  ;;  %1804 = vmatprep.mubr.msk.bf16.mxu0 %vm2095_vm0, %v2094_v0 }
0x190a   :  { %1802 = vmatprep.subr.bf16.mxu0 %v2094_v0 }
0x190d   :  { %1803 = vmatpush3.bf16.msra.mxu0 %v2367_v6 }
0x190e   :  { %1816 = vmatprep.subr.bf16.mxu0 %v2094_v0 }
0x1968   :  { %v2434_v59 = vpop.f32.mrb[24].mxu0 }
0x1969   :  { %v2436_v11 = vpop.f32.mrb[25].mxu0 }
0x196a   :  { %v2438_v3 = vpop.f32.mrb[26].mxu0  ;;  %v875_v62 = vadd.f32 %v2391_v14, %v2436_v11 }
0x196b   :  { %v2440_v23 = vpop.f32.mrb[27].mxu0 }
0x19db   :  { %v1079_v24 = vpop.f32.mrb[28].mxu0 }
0x19dc   :  { %v1085_v25 = vadd.f32 %v1079_v24, %v867_v12  ;;  %v1790_v2 = vpop.f32.mrb[29].mxu0 }
0x19dd   :  { %v1082_v26 = vpop.f32.mrb[30].mxu0 }
0x19de   :  { %1941 = vtanh.f32 %v1085_v25  ;;  %v1791_v27 = vpop.f32.mrb[31].mxu0  ;;  %v1605_v29 = vmul.f32 -1.442695, %v1085_v25 }
0x19e0   :  { %1943 = vpow2.f32 %v1605_v29 }
0x19e8   :  { %v1942_v9 = vpop.eup %1941 }
0x19e9   :  { %1095 = vrot.lane.b32.xlu1 %v1942_v9, %s2088_s19  ;;  %v878_v9 = vadd.f32 %v2391_v14, %v2440_v23 }
0x19ea   :  { %v1944_v30 = vpop.eup %1943 }
0x19eb   :  { %v1089_v4 = vadd.f32 1.0, %v1944_v30 }
0x19ed   :  { %1945 = vrcp.f32 %v1089_v4 }
0x19f7   :  { %v1946_v31 = vpop.eup %1945 }
0x19f8   :  { %v1093_v16 = vmul.f32 %v1946_v31, %v1031_v49 }
0x1a5b   :  { %v1096_v32 = vpop.permute.xlu1 %1095 }
0x1a5c   :  { %v1098_v33 = vmul.f32 %v1946_v31, %v1096_v32 }
0x1a5e   :  { %1100 = vrot.lane.b32.xlu0 %v1098_v33, %s2097_s3 }
0x1ad0   :  { %v1101_v35 = vpop.permute.xlu0 %1100 }
0x1ad1   :  { %v1103_v37 = vadd.f32 %v1101_v35, %v1093_v16 }
0x1ad3   :  { %1947 = vtanh.f32 %v1103_v37 }
0x1add   :  { %v1948_v38 = vpop.eup %1947 }
0x1ade   :  { %1106 = vrot.lane.b32.xlu1 %v1948_v38, %s2088_s19 }
0x1b50   :  { %v1107_v39 = vpop.permute.xlu1 %1106 }
0x1b51   :  { %v1109_v40 = vmul.f32 %v1946_v31, %v1107_v39 }
0x1b53   :  { %v1110_v41 = vpack.c.bf16 %v1109_v40, %v1109_v40 }
0x1b55   :  { %1112 = vrot.lane.b32.xlu0 %v1110_v41, %s2097_s3 }
0x1bc7   :  { %v1113_v42 = vpop.permute.xlu0 %1112 }
0x1bc8   :  { %1797 = vmatmul.mubr.msk.bf16.vlgmr.msra.gmra.mrb[28].mxu1 %vm196_vm2, %v1113_v42 }
0x1bc9   :  { %1809 = vmatpush3.bf16.msra.mxu1 %v2363_v61  ;;  %1812 = vmatprep.mubr.msk.bf16.mxu1 %vm2095_vm0, %v2094_v0 }
0x1bca   :  { %1810 = vmatprep.subr.bf16.mxu1 %v2094_v0 }
0x1bcd   :  { %1811 = vmatpush3.bf16.msra.mxu1 %v2367_v6 }
0x1bce   :  { %1824 = vmatprep.subr.bf16.mxu1 %v2094_v0 }
0x1c9b   :  { %v1151_v44 = vpop.f32.mrb[28].mxu1 }
0x1c9c   :  { %v1157_v15 = vadd.f32 %v1151_v44, %v870_v43  ;;  %v1798_v45 = vpop.f32.mrb[29].mxu1 }
0x1c9d   :  { %v1154_v46 = vpop.f32.mrb[30].mxu1  ;;  %v883_v45 = vadd.f32 %v2434_v59, %v2391_v14 }
0x1c9e   :  { %1949 = vtanh.f32 %v1157_v15  ;;  %v1799_v47 = vpop.f32.mrb[31].mxu1  ;;  %v1607_v50 = vmul.f32 -1.442695, %v1157_v15 }
0x1ca0   :  { %1951 = vpow2.f32 %v1607_v50 }
0x1ca8   :  { %v1950_v48 = vpop.eup %1949 }
0x1ca9   :  { %1167 = vrot.lane.b32.xlu1 %v1950_v48, %s2088_s19 }
0x1caa   :  { %v1952_v51 = vpop.eup %1951 }
0x1cab   :  { %v1161_v63 = vadd.f32 1.0, %v1952_v51 }
0x1cad   :  { %1953 = vrcp.f32 %v1161_v63 }
0x1cb7   :  { %v1954_v52 = vpop.eup %1953 }
0x1cb8   :  { %v1165_v20 = vmul.f32 %v1954_v52, %v1103_v37 }
0x1d1b   :  { %v1168_v53 = vpop.permute.xlu1 %1167 }
0x1d1c   :  { %v1170_v54 = vmul.f32 %v1954_v52, %v1168_v53 }
0x1d1e   :  { %1172 = vrot.lane.b32.xlu0 %v1170_v54, %s2097_s3 }
0x1d90   :  { %v1173_v55 = vpop.permute.xlu0 %1172 }
0x1d91   :  { %v1175_v56 = vadd.f32 %v1173_v55, %v1165_v20 }
0x1d93   :  { %1955 = vtanh.f32 %v1175_v56 }
0x1d9d   :  { %v1956_v57 = vpop.eup %1955 }
0x1d9e   :  { %1178 = vrot.lane.b32.xlu1 %v1956_v57, %s2088_s19 }
0x1e10   :  { %v1179_v58 = vpop.permute.xlu1 %1178 }
0x1e11   :  { %v1181_v60 = vmul.f32 %v1954_v52, %v1179_v58 }
0x1e13   :  { %v1182_v17 = vpack.c.bf16 %v1181_v60, %v1181_v60 }
0x1e15   :  { %1184 = vrot.lane.b32.xlu0 %v1182_v17, %s2097_s3 }
0x1e87   :  { %v1185_v36 = vpop.permute.xlu0 %1184 }
0x1e88   :  { %1805 = vmatmul.mubr.msk.bf16.vlgmr.msra.gmra.mrb[32].mxu0 %vm196_vm2, %v1185_v36 }
0x1e89   :  { %1817 = vmatpush3.bf16.msra.mxu0 %v2363_v61  ;;  %1820 = vmatprep.mubr.msk.bf16.mxu0 %vm2095_vm0, %v2094_v0 }
0x1e8a   :  { %1818 = vmatprep.subr.bf16.mxu0 %v2094_v0 }
0x1e8d   :  { %1819 = vmatpush3.bf16.msra.mxu0 %v2367_v6 }
0x1e8e   :  { %1832 = vmatprep.subr.bf16.mxu0 %v2094_v0 }
0x1f5b   :  { %v1223_v34 = vpop.f32.mrb[32].mxu0 }
0x1f5c   :  { %v1229_v5 = vadd.f32 %v1223_v34, %v875_v62  ;;  %v1806_v7 = vpop.f32.mrb[33].mxu0 }
0x1f5d   :  { %v1226_v28 = vpop.f32.mrb[34].mxu0 }
0x1f5e   :  { %1957 = vtanh.f32 %v1229_v5  ;;  %v1807_v49 = vpop.f32.mrb[35].mxu0  ;;  %v1609_v1 = vmul.f32 -1.442695, %v1229_v5  ;;  %v886_v5 = vadd.f32 %v2438_v3, %v2391_v14 }
0x1f60   :  { %1959 = vpow2.f32 %v1609_v1 }
0x1f68   :  { %v1958_v10 = vpop.eup %1957 }
0x1f69   :  { %1239 = vrot.lane.b32.xlu1 %v1958_v10, %s2088_s19 }
0x1f6a   :  { %v1960_v8 = vpop.eup %1959 }
0x1f6b   :  { %v1233_v13 = vadd.f32 1.0, %v1960_v8 }
0x1f6d   :  { %1961 = vrcp.f32 %v1233_v13 }
0x1f77   :  { %v1962_v18 = vpop.eup %1961 }
0x1f78   :  { %v1237_v22 = vmul.f32 %v1962_v18, %v1175_v56 }
0x1fdb   :  { %v1240_v19 = vpop.permute.xlu1 %1239 }
0x1fdc   :  { %v1242_v21 = vmul.f32 %v1962_v18, %v1240_v19 }
0x1fde   :  { %1244 = vrot.lane.b32.xlu0 %v1242_v21, %s2097_s3 }
0x2050   :  { %v1245_v11 = vpop.permute.xlu0 %1244 }
0x2051   :  { %v1247_v12 = vadd.f32 %v1245_v11, %v1237_v22 }
0x2053   :  { %1963 = vtanh.f32 %v1247_v12 }
0x205d   :  { %v1964_v24 = vpop.eup %1963 }
0x205e   :  { %1250 = vrot.lane.b32.xlu1 %v1964_v24, %s2088_s19  ;;  %v1859_v24 = vld [vmem:[%s2535_s7] sm:$0xff]  }
0x20d0   :  { %v1251_v25 = vpop.permute.xlu1 %1250 }
0x20d1   :  { %v1253_v2 = vmul.f32 %v1962_v18, %v1251_v25  ;;  %v1860_v25 = vld [vmem:[%s2535_s7 + $0x8] sm:$0xff]   ;;  %s2098_s7 = smov [#allocation8]  }
0x20d3   :  { %v1254_v26 = vpack.c.bf16 %v1253_v2, %v1253_v2 }
0x20d5   :  { %1256 = vrot.lane.b32.xlu0 %v1254_v26, %s2097_s3 }
0x2147   :  { %v1257_v27 = vpop.permute.xlu0 %1256 }
0x2148   :  { %1813 = vmatmul.mubr.msk.bf16.vlgmr.msra.gmra.mrb[32].mxu1 %vm196_vm2, %v1257_v27 }
0x2149   :  { %1825 = vmatpush3.bf16.msra.mxu1 %v2363_v61  ;;  %1828 = vmatprep.mubr.msk.bf16.mxu1 %vm2095_vm0, %v2094_v0 }
0x214a   :  { %1826 = vmatprep.subr.bf16.mxu1 %v2094_v0 }
0x214d   :  { %1827 = vmatpush3.bf16.msra.mxu1 %v2367_v6 }
0x221b   :  { %v1295_v29 = vpop.f32.mrb[32].mxu1 }
0x221c   :  { %v1301_v30 = vadd.f32 %v1295_v29, %v878_v9  ;;  %v1814_v4 = vpop.f32.mrb[33].mxu1 }
0x221d   :  { %v1298_v31 = vpop.f32.mrb[34].mxu1 }
0x221e   :  { %1965 = vtanh.f32 %v1301_v30  ;;  %v1815_v32 = vpop.f32.mrb[35].mxu1  ;;  %v1611_v61 = vmul.f32 -1.442695, %v1301_v30  ;;  %v1616_v30 = vld [vmem:[%s2536_s8] ss:$0 sm:$0xff]  ;;  %s1559_s8 = sshll.u32 %s2098_s7, 4  ;;  %s1560_s8 = int_to_ptr.vmem [resolvable:$true] %s1559_s8 }
0x221f   :  { %p2064_p11 = scmp.lt.s32.totalorder %s1560_s8, %s1560_s8 }
0x2220   :  { %1967 = vpow2.f32 %v1611_v61 }
0x2228   :  { %v1966_v33 = vpop.eup %1965 }
0x2229   :  { %1311 = vrot.lane.b32.xlu1 %v1966_v33, %s2088_s19 }
0x222a   :  { %v1968_v16 = vpop.eup %1967 }
0x222b   :  { %v1305_v35 = vadd.f32 1.0, %v1968_v16 }
0x222d   :  { %1969 = vrcp.f32 %v1305_v35 }
0x2237   :  { %v1970_v37 = vpop.eup %1969 }
0x2238   :  { %v1309_v23 = vmul.f32 %v1970_v37, %v1247_v12 }
0x229b   :  { %v1312_v38 = vpop.permute.xlu1 %1311 }
0x229c   :  { %v1314_v6 = vmul.f32 %v1970_v37, %v1312_v38 }
0x229e   :  { %1316 = vrot.lane.b32.xlu0 %v1314_v6, %s2097_s3 }
0x2310   :  { %v1317_v39 = vpop.permute.xlu0 %1316 }
0x2311   :  { %v1319_v40 = vadd.f32 %v1317_v39, %v1309_v23 }
0x2313   :  { %1971 = vtanh.f32 %v1319_v40 }
0x231d   :  { %v1972_v41 = vpop.eup %1971 }
0x231e   :  { %1322 = vrot.lane.b32.xlu1 %v1972_v41, %s2088_s19 }
0x2390   :  { %v1323_v42 = vpop.permute.xlu1 %1322 }
0x2391   :  { %v1325_v43 = vmul.f32 %v1970_v37, %v1323_v42 }
0x2393   :  { %v1326_v44 = vpack.c.bf16 %v1325_v43, %v1325_v43 }
0x2395   :  { %1328 = vrot.lane.b32.xlu0 %v1326_v44, %s2097_s3 }
0x2407   :  { %v1329_v15 = vpop.permute.xlu0 %1328 }
0x2408   :  { %1821 = vmatmul.mubr.msk.bf16.vlgmr.msra.gmra.mrb[36].mxu0 %vm196_vm2, %v1329_v15 }
0x2409   :  { %1836 = vmatprep.mubr.msk.bf16.mxu0 %vm2095_vm0, %v2094_v0  ;;  %1833 = vmatpush3.bf16.msra.mxu0 %v1859_v24 }
0x240a   :  { %1834 = vmatprep.subr.bf16.mxu0 %v2094_v0 }
0x240d   :  { %1835 = vmatpush3.bf16.msra.mxu0 %v1860_v25 }
0x24db   :  { %v1367_v46 = vpop.f32.mrb[36].mxu0 }
0x24dc   :  { %v1373_v47 = vadd.f32 %v1367_v46, %v883_v45  ;;  %v1822_v48 = vpop.f32.mrb[37].mxu0 }
0x24dd   :  { %v1370_v50 = vpop.f32.mrb[38].mxu0 }
0x24de   :  { %1973 = vtanh.f32 %v1373_v47  ;;  %v1823_v51 = vpop.f32.mrb[39].mxu0  ;;  %v1613_v52 = vmul.f32 -1.442695, %v1373_v47 }
0x24e0   :  { %1975 = vpow2.f32 %v1613_v52 }
0x24e8   :  { %v1974_v63 = vpop.eup %1973 }
0x24e9   :  { %1383 = vrot.lane.b32.xlu1 %v1974_v63, %s2088_s19 }
0x24ea   :  { %v1976_v53 = vpop.eup %1975 }
0x24eb   :  { %v1377_v54 = vadd.f32 1.0, %v1976_v53 }
0x24ed   :  { %1977 = vrcp.f32 %v1377_v54 }
0x24f7   :  { %v1978_v20 = vpop.eup %1977 }
0x24f8   :  { %v1381_v59 = vmul.f32 %v1978_v20, %v1319_v40 }
0x255b   :  { %v1384_v55 = vpop.permute.xlu1 %1383 }
0x255c   :  { %v1386_v56 = vmul.f32 %v1978_v20, %v1384_v55 }
0x255e   :  { %1388 = vrot.lane.b32.xlu0 %v1386_v56, %s2097_s3 }
0x25d0   :  { %v1389_v57 = vpop.permute.xlu0 %1388 }
0x25d1   :  { %v1391_v58 = vadd.f32 %v1389_v57, %v1381_v59 }
0x25d3   :  { %1979 = vtanh.f32 %v1391_v58 }
0x25dd   :  { %v1980_v60 = vpop.eup %1979 }
0x25de   :  { %1394 = vrot.lane.b32.xlu1 %v1980_v60, %s2088_s19 }
0x2650   :  { %v1395_v17 = vpop.permute.xlu1 %1394 }
0x2651   :  { %v1397_v36 = vmul.f32 %v1978_v20, %v1395_v17 }
0x2653   :  { %v1398_v62 = vpack.c.bf16 %v1397_v36, %v1397_v36 }
0x2655   :  { %1400 = vrot.lane.b32.xlu0 %v1398_v62, %s2097_s3 }
0x26c7   :  { %v1401_v34 = vpop.permute.xlu0 %1400 }
0x26c8   :  { %1829 = vmatmul.mubr.msk.bf16.vlgmr.msra.gmra.mrb[36].mxu1 %vm196_vm2, %v1401_v34 }
0x279b   :  { %v1439_v7 = vpop.f32.mrb[36].mxu1 }
0x279c   :  { %v1445_v28 = vadd.f32 %v1439_v7, %v886_v5  ;;  %v1830_v49 = vpop.f32.mrb[37].mxu1 }
0x279d   :  { %v1442_v10 = vpop.f32.mrb[38].mxu1 }
0x279e   :  { %1981 = vtanh.f32 %v1445_v28  ;;  %v1831_v1 = vpop.f32.mrb[39].mxu1  ;;  %v1615_v13 = vmul.f32 -1.442695, %v1445_v28 }
0x27a0   :  { %1983 = vpow2.f32 %v1615_v13 }
0x27a8   :  { %v1982_v8 = vpop.eup %1981 }
0x27a9   :  { %1455 = vrot.lane.b32.xlu1 %v1982_v8, %s2088_s19 }
0x27aa   :  { %v1984_v18 = vpop.eup %1983 }
0x27ab   :  { %v1449_v19 = vadd.f32 1.0, %v1984_v18 }
0x27ad   :  { %1985 = vrcp.f32 %v1449_v19 }
0x27b7   :  { %v1986_v21 = vpop.eup %1985 }
0x27b8   :  { %v1453_v14 = vmul.f32 %v1986_v21, %v1391_v58 }
0x281b   :  { %v1456_v22 = vpop.permute.xlu1 %1455 }
0x281c   :  { %v1458_v11 = vmul.f32 %v1986_v21, %v1456_v22 }
0x281e   :  { %1460 = vrot.lane.b32.xlu0 %v1458_v11, %s2097_s3 }
0x2890   :  { %v1461_v3 = vpop.permute.xlu0 %1460 }
0x2891   :  { %v1463_v12 = vadd.f32 %v1461_v3, %v1453_v14 }
0x2893   :  { %1987 = vtanh.f32 %v1463_v12 }
0x289d   :  { %v1988_v2 = vpop.eup %1987 }
0x289e   :  { %1466 = vrot.lane.b32.xlu1 %v1988_v2, %s2088_s19  ;;  %s2059_s19 = scalar_lea.vmem %s1560_s8, 128 }
0x289f   :  { %p2060_p10 = scmp.ne.s32.totalorder %s1560_s8, %s2059_s19  ;;  %p2065_p12 = scmp.lt.s32.totalorder %s2059_s19, %s2059_s19 }
0x28a1   :  { %p2066_p13 = por %p2065_p12, %p2064_p11 }
0x28a3   :  { %p2067_p0 = pnand %p2066_p13, %p2060_p10 }
0x2910   :  { %v1467_v26 = vpop.permute.xlu1 %1466 }
0x2911   :  { %v1469_v27 = vmul.f32 %v1986_v21, %v1467_v26 }
0x2913   :  { %v1475_v9 = vpack.c.bf16 %v1469_v27, %v1469_v27 }
0x2915   :  { %1483 = vrot.lane.b32.xlu0 %v1475_v9, %s2097_s3 }
0x2987   :  { %v1484_v29 = vpop.permute.xlu0 %1483 }
0x2988   :  { %1837 = vmatmul.mubr.msk.bf16.vlgmr.msra.gmra.mrb[40].mxu0 %vm196_vm2, %v1484_v29 }
0x2a5b   :  { %v1534_v4 = vpop.f32.mrb[40].mxu0 }
0x2a5c   :  { %v1535_v31 = vadd.f32 %v1616_v30, %v1534_v4  ;;  %v1838_v0 = vpop.f32.mrb[41].mxu0 }
0x2a5d   :  { %v1537_v32 = vpop.f32.mrb[42].mxu0 }
0x2a5e   :  { %v1839_v33 = vpop.f32.mrb[43].mxu0  ;;  %v1541_v61 = vsel %vm1540_vm3, %v1535_v31, -inf }
0x2a5f   :  { %1542 = vmax.xlane.f32.xlu1 %v1541_v61 }
0x2aec   :  { %v1543_v16 = vpop.xlane.xlu1 %1542 }
0x2aed   :  { %v1544_v35 = vsub.f32 %v1535_v31, %v1543_v16 }
0x2aef   :  { %v1545_v37 = vmul.f32 1.442695, %v1544_v35 }
0x2af1   :  { %1989 = vpow2.f32 %v1545_v37 }
0x2afb   :  { %v1990_v38 = vpop.eup %1989 }
0x2afc   :  { %v1547_v6 = vsel %vm1540_vm3, %v1990_v38, 0.0 }
0x2afd   :  { %1548 = vadd.xlane.f32.xlu0 %v1547_v6 }
0x2b8a   :  { %v1549_v23 = vpop.xlane.xlu0 %1548 }
0x2b8b   :  { %1991 = vrcp.f32 %v1549_v23 }
0x2b95   :  { %v1992_v39 = vpop.eup %1991 }
0x2b96   :  { %v1551_v40 = vmul.f32 %v1992_v39, %v1990_v38 }
0x2b98   :  { %1552 = vst.msk [vmem:[#allocation8] sm:$0xff] %vm1540_vm3, %v1551_v40 }
0x2b99   :  { %2070 = shalt.err (!%p2067_p0)
}
0x2b9a   :  { %s2071_s23 = scalar_lea.hbm %s2537_s9, 128 }
0x2b9b   :  { %p2072_p1 = scmp.ne.s32.totalorder %s2537_s9, %s2071_s23  ;;  %p2075_p2 = scmp.lt.u32.totalorder %s2071_s23, %s2537_s9 }
0x2b9d   :  { %p2077_p3 = pnand %p2075_p2, %p2072_p1 }
0x2b9f   :  { %2080 = shalt.err (!%p2077_p3)
}
0x2ba0   :  { %1562 = dma.vmem_to_hbm [thread:$0]  %s1560_s8, 128, %s2537_s9, [#allocation4]  }
0x2ba1   :  { %2085 = dma.done.wait [#allocation4], 128  }
0x2ba2   :  { %2086 = vsyncadd [#allocation4], 4294967168 }
0x2ba3   :  { %1566 = vsyncpa [#allocation3], 1 }
0x2ba4   :  { %1567 = vsyncpa [#allocation6], 1 }
0x2ba5   :  { %1568 = vsyncpa [#allocation4], 1 }

</bundles_post_ra>
